<compile_context>
chip_gen: v7x
topology: tpu7x:2x2x1
jax: 0.10.0
libtpu: 0.0.40
codegen_flags: <defaults>
</compile_context>

<pallas_src>
import functools

import jax
import jax.numpy as jnp
from jax import lax
from jax.experimental import pallas as pl
from jax.experimental.pallas import tpu as pltpu


# ----------------------------------------------------------------------------
# Pallas kernel
# ----------------------------------------------------------------------------
def _deepfactor_kernel(x_ref, wih_ref, bih_ref, whh_ref, bhhn_ref,
                       wp2_ref, bp2_ref, out_ref,
                       gi_f_ref, gi_b_ref, hcat_ref, *, T, H, BT):
    """One batch tile (BT sequences): both GRUs, both directions, both outputs."""
    GP = 2 * H  # fused hidden width of the 2 chains (global + local) per direction
    bf16 = jnp.bfloat16

    # ---- fused input-gate precompute: one MXU matmul per direction ------------
    x2 = x_ref[0]                                                  # (T*BT, TF) bf16
    gi_f_ref[...] = (jnp.dot(x2, wih_ref[0], preferred_element_type=jnp.float32)
                     + bih_ref[0])
    gi_b_ref[...] = (jnp.dot(x2, wih_ref[1], preferred_element_type=jnp.float32)
                     + bih_ref[1])

    whh_f = whh_ref[0]                                             # (2H, 6H) bf16
    whh_b = whh_ref[1]
    bn_f = bhhn_ref[0]                                             # (1, 2H) f32
    bn_b = bhhn_ref[1]

    def _gru(gi_t, gh_t, h_t, bn):
        # gate layout along lanes: [r(2H) | z(2H) | n(2H)], each gate = [global,local]
        rz = jax.nn.sigmoid(gi_t[:, :2 * GP] + gh_t[:, :2 * GP])   # one wide EUP pass
        r = rz[:, :GP]
        z = rz[:, GP:]
        n = jnp.tanh(gi_t[:, 2 * GP:] + r * (gh_t[:, 2 * GP:] + bn))
        return n + z * (h_t - n)                                   # == (1-z)*n + z*h

    def step(s, carry):
        h_f, h_b = carry                                           # (BT, 2H) f32 each
        sf = pl.multiple_of(s * BT, BT)                            # fwd: time s
        sb = pl.multiple_of((T - 1 - s) * BT, BT)                  # bwd: time T-1-s
        # two independent recurrence matmuls (4 chains total) issued back-to-back
        gh_f = jnp.dot(h_f.astype(bf16), whh_f,
                       preferred_element_type=jnp.float32)         # (BT, 6H)
        gh_b = jnp.dot(h_b.astype(bf16), whh_b,
                       preferred_element_type=jnp.float32)
        h_f = _gru(gi_f_ref[pl.ds(sf, BT), :], gh_f, h_f, bn_f)
        h_b = _gru(gi_b_ref[pl.ds(sb, BT), :], gh_b, h_b, bn_b)
        hcat_ref[pl.ds(sf, BT), :GP] = h_f                         # [h_gf | h_lf]
        hcat_ref[pl.ds(sb, BT), GP:] = h_b                         # [h_gb | h_lb]
        return (h_f, h_b)

    zero = jnp.zeros((BT, GP), jnp.float32)
    lax.fori_loop(0, T, step, (zero, zero),
                  unroll=True if T <= 16 else 8)

    # ---- loading-folded projection + output nonlinearities, lane-dense --------
    # (2, T*BT) = wp2 (2, 4H) @ hcat^T (4H, T*BT)   [A @ B^T via dot_general]
    hc = hcat_ref[...].astype(bf16)                                # (T*BT, 4H)
    projT = lax.dot_general(wp2_ref[...], hc,
                            dimension_numbers=(((1,), (1,)), ((), ())),
                            preferred_element_type=jnp.float32) + bp2_ref[...]
    fixed_row = jnp.exp(projT[0:1, :])                             # (1, T*BT)
    zl = projT[1:2, :]
    rand_row = jnp.maximum(zl, 0.0) + jnp.log1p(jnp.exp(-jnp.abs(zl)))  # softplus
    out_ref[0] = jnp.concatenate([fixed_row, rand_row], axis=0)    # (2, T*BT)


# ----------------------------------------------------------------------------
# Host-side fused-parameter construction (exact algebra, tiny tensors)
# ----------------------------------------------------------------------------
def _build_fused_params(p, *, H, E):
    f32, bf16 = jnp.float32, jnp.bfloat16
    emb = p["emb_b"].astype(f32)                       # Linear(1,E)(zeros) == bias
    load_vec = emb @ p["load_w"].astype(f32).T         # (F,) batch-constant loadings

    wih_dirs, bih_dirs, whh_dirs, bhhn_dirs = [], [], [], []
    for d in range(2):                       # 0 = forward, 1 = backward
        wcols, bcols = [], []
        for g in range(3):                   # torch GRU gate order: r, z, n
            rs, re = g * H, (g + 1) * H
            # ---- global chain ----
            wcols.append(p["g_w_ih"][d][rs:re, :].T)                 # (TF, H)
            bg = p["g_b_ih"][d][rs:re]
            if g < 2:
                bg = bg + p["g_b_hh"][d][rs:re]                      # fold b_hh for r,z
            bcols.append(bg)
            # ---- local chain (embed part of input folded into bias) ----
            wl = p["l_w_ih"][d][rs:re, :]                            # (H, E+TF)
            wcols.append(wl[:, E:].T)                                # (TF, H)
            bl = p["l_b_ih"][d][rs:re] + wl[:, :E] @ emb
            if g < 2:
                bl = bl + p["l_b_hh"][d][rs:re]
            bcols.append(bl)
        wih_dirs.append(jnp.concatenate(wcols, axis=1))              # (TF, 6H)
        bih_dirs.append(jnp.concatenate(bcols)[None, :])             # (1, 6H)

        whh = jnp.zeros((2 * H, 6 * H), f32)                         # block-diagonal
        for m, key in enumerate(("g_w_hh", "l_w_hh")):
            for g in range(3):
                blk = p[key][d][g * H:(g + 1) * H, :].T              # (H, H)
                c0 = g * 2 * H + m * H
                whh = whh.at[m * H:(m + 1) * H, c0:c0 + H].set(blk)
        whh_dirs.append(whh)
        bhhn_dirs.append(jnp.concatenate(
            [p["g_b_hh"][d][2 * H:], p["l_b_hh"][d][2 * H:]])[None, :])  # (1, 2H)

    wih_all = jnp.stack(wih_dirs).astype(bf16)      # (2, TF, 6H)  bf16 MXU operand
    bih_all = jnp.stack(bih_dirs).astype(f32)       # (2, 1, 6H)
    whh_all = jnp.stack(whh_dirs).astype(bf16)      # (2, 2H, 6H)  bf16 MXU operand
    bhhn_all = jnp.stack(bhhn_dirs).astype(f32)     # (2, 1, 2H)

    # Loading-folded projection: 2 output rows = [fixed_logit | random_logit].
    # hcat lane layout: [h_global_fwd | h_local_fwd | h_global_bwd | h_local_bwd].
    gw = p["g_w_proj"].astype(f32)                  # (F, 2H)
    lw = p["l_w_proj"].astype(f32)                  # (1, 2H)
    wfix = jnp.zeros((4 * H,), f32)
    wfix = wfix.at[0:H].set(load_vec @ gw[:, :H])                    # global fwd
    wfix = wfix.at[2 * H:3 * H].set(load_vec @ gw[:, H:])            # global bwd
    wloc = jnp.zeros((4 * H,), f32)
    wloc = wloc.at[H:2 * H].set(lw[0, :H])                           # local fwd
    wloc = wloc.at[3 * H:4 * H].set(lw[0, H:])                       # local bwd
    wp2 = jnp.stack([wfix, wloc]).astype(bf16)      # (2, 4H)
    bp2 = jnp.stack([jnp.dot(load_vec, p["g_b_proj"].astype(f32)),
                     p["l_b_proj"].astype(f32)[0]]).reshape(2, 1)    # (2, 1) f32
    return wih_all, bih_all, whh_all, bhhn_all, wp2, bp2


def _pick_bt(B, T, H, max_bt=128):
    """Batch tile: 8 for tiny batches, else ~half the padded batch (NT >= 2 tiles)."""
    b_pad8 = -(-B // 8) * 8
    if b_pad8 <= 8:
        bt = 8
    else:
        bt = min(max_bt, max(8, -(-(b_pad8 // 2) // 8) * 8))
    # VMEM guard: gi_f + gi_b + hcat scratch = 16*H*T*BT*4 bytes; keep well under the
    # scoped-VMEM limit on every generation (v5e default 16 MiB, v7x 64 MiB physical).
    while bt > 8 and 16 * H * T * bt * 4 > 12 * 2**20:
        bt -= 8
    return bt


# ----------------------------------------------------------------------------
# Forward wrapper
# ----------------------------------------------------------------------------
def deepfactor_forward(x, x_mark, y_mark, params, *, batch_tile=None):
    """Pallas DeepFactor.forward (x, y_mark are unused by the torch forward)."""
    del x, y_mark
    B, T, TF = x_mark.shape
    H = params["g_w_hh"].shape[-1]
    E = params["emb_b"].shape[0]

    BT = batch_tile if batch_tile is not None else _pick_bt(B, T, H)
    B_pad = ((B + BT - 1) // BT) * BT
    NT = B_pad // BT

    wih_all, bih_all, whh_all, bhhn_all, wp2, bp2 = _build_fused_params(
        params, H=H, E=E)

    # batch-tiled, time-major input slab: x_tiles[n, t*BT + j, :] = x_mark[n*BT+j, t, :]
    xp = jnp.zeros((B_pad, T, TF), jnp.float32).at[:B].set(x_mark.astype(jnp.float32))
    x_tiles = xp.reshape(NT, BT, T, TF).transpose(0, 2, 1, 3).reshape(
        NT, T * BT, TF).astype(jnp.bfloat16)

    scratch_bytes = T * BT * (6 * H + 6 * H + 4 * H) * 4
    vmem_limit = int(min(56 * 2**20, max(24 * 2**20, 3 * scratch_bytes)))

    # TODO(synk): for NT == 1 on v7x, the two GRU directions could additionally be
    # split across the two TensorCores (core_map + shared hcat); not implemented.
    kernel = functools.partial(_deepfactor_kernel, T=T, H=H, BT=BT)
    out = pl.pallas_call(
        kernel,
        out_shape=jax.ShapeDtypeStruct((NT, 2, T * BT), jnp.float32),
        grid_spec=pltpu.PrefetchScalarGridSpec(
            num_scalar_prefetch=0,
            grid=(NT,),
            in_specs=[
                pl.BlockSpec((1, T * BT, TF), lambda b: (b, 0, 0)),   # x tile (bf16)
                pl.BlockSpec(wih_all.shape, lambda b: (0, 0, 0)),
                pl.BlockSpec(bih_all.shape, lambda b: (0, 0, 0)),
                pl.BlockSpec(whh_all.shape, lambda b: (0, 0, 0)),
                pl.BlockSpec(bhhn_all.shape, lambda b: (0, 0, 0)),
                pl.BlockSpec(wp2.shape, lambda b: (0, 0)),
                pl.BlockSpec(bp2.shape, lambda b: (0, 0)),
            ],
            out_specs=pl.BlockSpec((1, 2, T * BT), lambda b: (b, 0, 0)),
            scratch_shapes=[
                pltpu.VMEM((T * BT, 6 * H), jnp.float32),   # gi, forward direction
                pltpu.VMEM((T * BT, 6 * H), jnp.float32),   # gi, backward direction
                pltpu.VMEM((T * BT, 4 * H), jnp.float32),   # hidden states, 4 chains
            ],
        ),
        compiler_params=pltpu.CompilerParams(
            dimension_semantics=("parallel",),
            vmem_limit_bytes=vmem_limit),
    )(x_tiles, wih_all, bih_all, whh_all, bhhn_all, wp2, bp2)

    def _unpack(col):  # (NT, T*BT) lane-major -> (B, T, 1)
        return (out[:, col].reshape(NT, T, BT).transpose(0, 2, 1)
                .reshape(B_pad, T)[:B][..., None])

    return _unpack(0), _unpack(1)


# ----------------------------------------------------------------------------
# Pure-JAX reference (mirrors the torch module directly) for correctness check
# ----------------------------------------------------------------------------
def _gru_dir_ref(x, w_ih, w_hh, b_ih, b_hh, reverse):
    B, T, _ = x.shape
    H = w_hh.shape[1]
    h = jnp.zeros((B, H), jnp.float32)
    outs = [None] * T
    order = range(T - 1, -1, -1) if reverse else range(T)
    for t in order:
        gi = x[:, t] @ w_ih.T + b_ih
        gh = h @ w_hh.T + b_hh
        r = jax.nn.sigmoid(gi[:, :H] + gh[:, :H])
        z = jax.nn.sigmoid(gi[:, H:2 * H] + gh[:, H:2 * H])
        n = jnp.tanh(gi[:, 2 * H:] + r * gh[:, 2 * H:])
        h = (1.0 - z) * n + z * h
        outs[t] = h
    return jnp.stack(outs, axis=1)


def _recurrent_module_ref(x, w_ih, w_hh, b_ih, b_hh, w_p, b_p):
    hf = _gru_dir_ref(x, w_ih[0], w_hh[0], b_ih[0], b_hh[0], False)
    hb = _gru_dir_ref(x, w_ih[1], w_hh[1], b_ih[1], b_hh[1], True)
    return jnp.concatenate([hf, hb], axis=-1) @ w_p.T + b_p


def deepfactor_ref(x_mark, p):
    B, T, _ = x_mark.shape
    embed = jnp.zeros((B, 1), jnp.float32) @ p["emb_w"].T + p["emb_b"]     # (B, E)
    loadings = embed @ p["load_w"].T                                       # (B, F)
    local_input = jnp.concatenate(
        [jnp.broadcast_to(embed[:, None, :], (B, T, p["emb_b"].shape[0])), x_mark],
        axis=2)
    gf = _recurrent_module_ref(x_mark, p["g_w_ih"], p["g_w_hh"], p["g_b_ih"],
                               p["g_b_hh"], p["g_w_proj"], p["g_b_proj"])
    fixed = jnp.exp(jnp.einsum("btf,bf->bt", gf, loadings))[..., None]
    lo = _recurrent_module_ref(local_input, p["l_w_ih"], p["l_w_hh"], p["l_b_ih"],
                               p["l_b_hh"], p["l_w_proj"], p["l_b_proj"])
    rnd = jnp.log(jnp.exp(lo) + 1.0)
    return fixed, rnd


# ----------------------------------------------------------------------------
# Main
# ----------------------------------------------------------------------------
if __name__ == "__main__":
    # Small config consistent with the module: freq='H' -> time_feat=5,
    # embedding_dim=8 -> E=40, num_hidden_global=16 (used by BOTH GRUs, as in the
    # torch code), num_factors=8, hist_len=8, pred_len=4, c_in=4.
    B, T, PRED = 2, 8, 4
    C_IN, TF = 4, 5
    H, F, EMB = 16, 8, 8
    E = EMB * TF          # 40
    DL = TF + E           # 45

    key = jax.random.PRNGKey(0)
    ks = jax.random.split(key, 24)

    def nrm(k, shape, scale=0.1):
        return scale * jax.random.normal(k, shape, dtype=jnp.float32)

    params = dict(
        g_w_ih=nrm(ks[0], (2, 3 * H, TF)), g_w_hh=nrm(ks[1], (2, 3 * H, H)),
        g_b_ih=nrm(ks[2], (2, 3 * H)),     g_b_hh=nrm(ks[3], (2, 3 * H)),
        g_w_proj=nrm(ks[4], (F, 2 * H)),   g_b_proj=nrm(ks[5], (F,)),
        l_w_ih=nrm(ks[6], (2, 3 * H, DL)), l_w_hh=nrm(ks[7], (2, 3 * H, H)),
        l_b_ih=nrm(ks[8], (2, 3 * H)),     l_b_hh=nrm(ks[9], (2, 3 * H)),
        l_w_proj=nrm(ks[10], (1, 2 * H)),  l_b_proj=nrm(ks[11], (1,)),
        emb_w=nrm(ks[12], (E, 1)),         emb_b=nrm(ks[13], (E,)),
        load_w=nrm(ks[14], (F, E)),
    )

    x = nrm(ks[15], (B, T, C_IN), scale=1.0)        # unused by the forward
    x_mark = nrm(ks[16], (B, T, TF), scale=1.0)
    y_mark = nrm(ks[17], (B, PRED, TF), scale=1.0)  # unused by the forward

    fixed, random = jax.jit(deepfactor_forward)(x, x_mark, y_mark, params)
    fixed, random = jax.block_until_ready((fixed, random))

    ref_fixed, ref_random = deepfactor_ref(x_mark, params)

    assert fixed.shape == (B, T, 1) and random.shape == (B, T, 1)
    # Tolerance accounts for bf16 MXU operands (standard TPU matmul precision)
    # accumulated over the T-step recurrence; the f32 reference is exact.
    ok = bool(jnp.allclose(fixed, ref_fixed, rtol=2e-2, atol=2e-3)) and \
         bool(jnp.allclose(random, ref_random, rtol=2e-2, atol=2e-3))
    if not ok:
        raise AssertionError("Pallas DeepFactor output mismatch vs reference")
    print("KERNEL_OK")
</pallas_src>

<mosaic_0001>
module attributes {stable_mosaic.version = 11 : i64} {
  func.func @_deepfactor_kernel(%arg0: i32, %arg1: memref<1x64x5xbf16, #tpu.memory_space<vmem>>, %arg2: memref<2x5x96xbf16, #tpu.memory_space<vmem>>, %arg3: memref<2x1x96xf32, #tpu.memory_space<vmem>>, %arg4: memref<2x32x96xbf16, #tpu.memory_space<vmem>>, %arg5: memref<2x1x32xf32, #tpu.memory_space<vmem>>, %arg6: memref<2x64xbf16, #tpu.memory_space<vmem>>, %arg7: memref<2x1xf32, #tpu.memory_space<vmem>>, %arg8: memref<1x2x64xf32, #tpu.memory_space<vmem>>, %arg9: memref<64x96xf32, #tpu.memory_space<vmem>>, %arg10: memref<64x96xf32, #tpu.memory_space<vmem>>, %arg11: memref<64x64xf32, #tpu.memory_space<vmem>>) attributes {dimension_semantics = [#tpu.dimension_semantics<parallel>], iteration_bounds = array<i64: 1>, scalar_prefetch = 0 : i64, scratch_operands = 3 : i64, tpu.core_type = #tpu.core_type<tc>, window_params = [{transform_indices = @transform_0, window_bounds = array<i64: 1, 64, 5>}, {pipeline_mode = #tpu.pipeline_mode<synchronous>, transform_indices = @transform_1, window_bounds = array<i64: 2, 5, 96>}, {pipeline_mode = #tpu.pipeline_mode<synchronous>, transform_indices = @transform_2, window_bounds = array<i64: 2, 1, 96>}, {pipeline_mode = #tpu.pipeline_mode<synchronous>, transform_indices = @transform_3, window_bounds = array<i64: 2, 32, 96>}, {pipeline_mode = #tpu.pipeline_mode<synchronous>, transform_indices = @transform_4, window_bounds = array<i64: 2, 1, 32>}, {pipeline_mode = #tpu.pipeline_mode<synchronous>, transform_indices = @transform_5, window_bounds = array<i64: 2, 64>}, {pipeline_mode = #tpu.pipeline_mode<synchronous>, transform_indices = @transform_6, window_bounds = array<i64: 2, 1>}, {transform_indices = @transform_7, window_bounds = array<i64: 1, 2, 64>}]} {
    %c0 = arith.constant 0 : index
    %c0_0 = arith.constant 0 : index
    %c0_1 = arith.constant 0 : index
    %0 = vector.load %arg1[%c0, %c0_0, %c0_1] : memref<1x64x5xbf16, #tpu.memory_space<vmem>>, vector<1x64x5xbf16>
    %1 = vector.shape_cast %0 : vector<1x64x5xbf16> to vector<64x5xbf16>
    %c0_2 = arith.constant 0 : index
    %c0_3 = arith.constant 0 : index
    %c0_4 = arith.constant 0 : index
    %2 = vector.load %arg2[%c0_2, %c0_3, %c0_4] : memref<2x5x96xbf16, #tpu.memory_space<vmem>>, vector<1x5x96xbf16>
    %3 = vector.shape_cast %2 : vector<1x5x96xbf16> to vector<5x96xbf16>
    %cst = arith.constant dense<0.000000e+00> : vector<64x96xf32>
    %4 = tpu.matmul %1, %3, %cst {dimension_numbers = #tpu.dot_dimension_numbers<[1], [0], [0], [1], [0, 0, 1, 1], [], []>} : vector<64x5xbf16>, vector<5x96xbf16>, vector<64x96xf32> -> vector<64x96xf32>
    %c0_5 = arith.constant 0 : index
    %c0_6 = arith.constant 0 : index
    %c0_7 = arith.constant 0 : index
    %5 = vector.load %arg3[%c0_5, %c0_6, %c0_7] : memref<2x1x96xf32, #tpu.memory_space<vmem>>, vector<1x1x96xf32>
    %6 = vector.shape_cast %5 : vector<1x1x96xf32> to vector<1x96xf32>
    %7 = vector.broadcast %6 : vector<1x96xf32> to vector<64x96xf32>
    %8 = arith.addf %4, %7 : vector<64x96xf32>
    %c0_8 = arith.constant 0 : index
    %c0_9 = arith.constant 0 : index
    %9 = vector.load %arg9[%c0_8, %c0_9] : memref<64x96xf32, #tpu.memory_space<vmem>>, vector<64x96xf32>
    tpu.vector_store %arg9[%c0_8, %c0_9], %8 {strides = array<i32>} : memref<64x96xf32, #tpu.memory_space<vmem>>, vector<64x96xf32>,
    %c1 = arith.constant 1 : index
    %c0_10 = arith.constant 0 : index
    %c0_11 = arith.constant 0 : index
    %10 = vector.load %arg2[%c1, %c0_10, %c0_11] : memref<2x5x96xbf16, #tpu.memory_space<vmem>>, vector<1x5x96xbf16>
    %11 = vector.shape_cast %10 : vector<1x5x96xbf16> to vector<5x96xbf16>
    %cst_12 = arith.constant dense<0.000000e+00> : vector<64x96xf32>
    %12 = tpu.matmul %1, %11, %cst_12 {dimension_numbers = #tpu.dot_dimension_numbers<[1], [0], [0], [1], [0, 0, 1, 1], [], []>} : vector<64x5xbf16>, vector<5x96xbf16>, vector<64x96xf32> -> vector<64x96xf32>
    %c1_13 = arith.constant 1 : index
    %c0_14 = arith.constant 0 : index
    %c0_15 = arith.constant 0 : index
    %13 = vector.load %arg3[%c1_13, %c0_14, %c0_15] : memref<2x1x96xf32, #tpu.memory_space<vmem>>, vector<1x1x96xf32>
    %14 = vector.shape_cast %13 : vector<1x1x96xf32> to vector<1x96xf32>
    %15 = vector.broadcast %14 : vector<1x96xf32> to vector<64x96xf32>
    %16 = arith.addf %12, %15 : vector<64x96xf32>
    %c0_16 = arith.constant 0 : index
    %c0_17 = arith.constant 0 : index
    %17 = vector.load %arg10[%c0_16, %c0_17] : memref<64x96xf32, #tpu.memory_space<vmem>>, vector<64x96xf32>
    tpu.vector_store %arg10[%c0_16, %c0_17], %16 {strides = array<i32>} : memref<64x96xf32, #tpu.memory_space<vmem>>, vector<64x96xf32>,
    %c0_18 = arith.constant 0 : index
    %c0_19 = arith.constant 0 : index
    %c0_20 = arith.constant 0 : index
    %18 = vector.load %arg4[%c0_18, %c0_19, %c0_20] : memref<2x32x96xbf16, #tpu.memory_space<vmem>>, vector<1x32x96xbf16>
    %19 = vector.shape_cast %18 : vector<1x32x96xbf16> to vector<32x96xbf16>
    %c1_21 = arith.constant 1 : index
    %c0_22 = arith.constant 0 : index
    %c0_23 = arith.constant 0 : index
    %20 = vector.load %arg4[%c1_21, %c0_22, %c0_23] : memref<2x32x96xbf16, #tpu.memory_space<vmem>>, vector<1x32x96xbf16>
    %21 = vector.shape_cast %20 : vector<1x32x96xbf16> to vector<32x96xbf16>
    %c0_24 = arith.constant 0 : index
    %c0_25 = arith.constant 0 : index
    %c0_26 = arith.constant 0 : index
    %22 = vector.load %arg5[%c0_24, %c0_25, %c0_26] : memref<2x1x32xf32, #tpu.memory_space<vmem>>, vector<1x1x32xf32>
    %23 = vector.shape_cast %22 : vector<1x1x32xf32> to vector<1x32xf32>
    %c1_27 = arith.constant 1 : index
    %c0_28 = arith.constant 0 : index
    %c0_29 = arith.constant 0 : index
    %24 = vector.load %arg5[%c1_27, %c0_28, %c0_29] : memref<2x1x32xf32, #tpu.memory_space<vmem>>, vector<1x1x32xf32>
    %25 = vector.shape_cast %24 : vector<1x1x32xf32> to vector<1x32xf32>
    %cst_30 = arith.constant 0.000000e+00 : f32
    %26 = vector.broadcast %cst_30 : f32 to vector<8x32xf32>
    %c0_i32 = arith.constant 0 : i32
    %c8_i32 = arith.constant 8 : i32
    %27 = arith.muli %c0_i32, %c8_i32 : i32
    %28 = tpu.assume_multiple %27, 8 : i32
    %c7_i32 = arith.constant 7 : i32
    %29 = arith.subi %c7_i32, %c0_i32 : i32
    %c8_i32_31 = arith.constant 8 : i32
    %30 = arith.muli %29, %c8_i32_31 : i32
    %31 = tpu.assume_multiple %30, 8 : i32
    %32 = arith.truncf %26 : vector<8x32xf32> to vector<8x32xbf16>
    %cst_32 = arith.constant dense<0.000000e+00> : vector<8x96xf32>
    %33 = tpu.matmul %32, %19, %cst_32 {dimension_numbers = #tpu.dot_dimension_numbers<[1], [0], [0], [1], [0, 0, 1, 1], [], []>} : vector<8x32xbf16>, vector<32x96xbf16>, vector<8x96xf32> -> vector<8x96xf32>
    %34 = arith.truncf %26 : vector<8x32xf32> to vector<8x32xbf16>
    %cst_33 = arith.constant dense<0.000000e+00> : vector<8x96xf32>
    %35 = tpu.matmul %34, %21, %cst_33 {dimension_numbers = #tpu.dot_dimension_numbers<[1], [0], [0], [1], [0, 0, 1, 1], [], []>} : vector<8x32xbf16>, vector<32x96xbf16>, vector<8x96xf32> -> vector<8x96xf32>
    %36 = arith.index_cast %28 : i32 to index
    %c0_34 = arith.constant 0 : index
    %37 = vector.load %arg9[%36, %c0_34] : memref<64x96xf32, #tpu.memory_space<vmem>>, vector<8x96xf32>
    %38 = vector.extract_strided_slice %37 {offsets = [0, 0], sizes = [8, 64], strides = [1, 1]} : vector<8x96xf32> to vector<8x64xf32>
    %39 = vector.extract_strided_slice %33 {offsets = [0, 0], sizes = [8, 64], strides = [1, 1]} : vector<8x96xf32> to vector<8x64xf32>
    %40 = arith.addf %38, %39 : vector<8x64xf32>
    %41 = arith.negf %40 : vector<8x64xf32>
    %42 = math.exp %41 : vector<8x64xf32>
    %cst_35 = arith.constant 1.000000e+00 : f32
    %43 = vector.broadcast %cst_35 : f32 to vector<8x64xf32>
    %44 = arith.addf %43, %42 : vector<8x64xf32>
    %45 = arith.divf %43, %44 : vector<8x64xf32>
    %46 = vector.extract_strided_slice %45 {offsets = [0, 0], sizes = [8, 32], strides = [1, 1]} : vector<8x64xf32> to vector<8x32xf32>
    %47 = vector.extract_strided_slice %45 {offsets = [0, 32], sizes = [8, 32], strides = [1, 1]} : vector<8x64xf32> to vector<8x32xf32>
    %48 = vector.extract_strided_slice %37 {offsets = [0, 64], sizes = [8, 32], strides = [1, 1]} : vector<8x96xf32> to vector<8x32xf32>
    %49 = vector.extract_strided_slice %33 {offsets = [0, 64], sizes = [8, 32], strides = [1, 1]} : vector<8x96xf32> to vector<8x32xf32>
    %50 = vector.broadcast %23 : vector<1x32xf32> to vector<8x32xf32>
    %51 = arith.addf %49, %50 : vector<8x32xf32>
    %52 = arith.mulf %46, %51 : vector<8x32xf32>
    %53 = arith.addf %48, %52 : vector<8x32xf32>
    %54 = math.tanh %53 : vector<8x32xf32>
    %55 = arith.subf %26, %54 : vector<8x32xf32>
    %56 = arith.mulf %47, %55 : vector<8x32xf32>
    %57 = arith.addf %54, %56 : vector<8x32xf32>
    %58 = arith.index_cast %31 : i32 to index
    %c0_36 = arith.constant 0 : index
    %59 = vector.load %arg10[%58, %c0_36] : memref<64x96xf32, #tpu.memory_space<vmem>>, vector<8x96xf32>
    %60 = vector.extract_strided_slice %59 {offsets = [0, 0], sizes = [8, 64], strides = [1, 1]} : vector<8x96xf32> to vector<8x64xf32>
    %61 = vector.extract_strided_slice %35 {offsets = [0, 0], sizes = [8, 64], strides = [1, 1]} : vector<8x96xf32> to vector<8x64xf32>
    %62 = arith.addf %60, %61 : vector<8x64xf32>
    %63 = arith.negf %62 : vector<8x64xf32>
    %64 = math.exp %63 : vector<8x64xf32>
    %cst_37 = arith.constant 1.000000e+00 : f32
    %65 = vector.broadcast %cst_37 : f32 to vector<8x64xf32>
    %66 = arith.addf %65, %64 : vector<8x64xf32>
    %67 = arith.divf %65, %66 : vector<8x64xf32>
    %68 = vector.extract_strided_slice %67 {offsets = [0, 0], sizes = [8, 32], strides = [1, 1]} : vector<8x64xf32> to vector<8x32xf32>
    %69 = vector.extract_strided_slice %67 {offsets = [0, 32], sizes = [8, 32], strides = [1, 1]} : vector<8x64xf32> to vector<8x32xf32>
    %70 = vector.extract_strided_slice %59 {offsets = [0, 64], sizes = [8, 32], strides = [1, 1]} : vector<8x96xf32> to vector<8x32xf32>
    %71 = vector.extract_strided_slice %35 {offsets = [0, 64], sizes = [8, 32], strides = [1, 1]} : vector<8x96xf32> to vector<8x32xf32>
    %72 = vector.broadcast %25 : vector<1x32xf32> to vector<8x32xf32>
    %73 = arith.addf %71, %72 : vector<8x32xf32>
    %74 = arith.mulf %68, %73 : vector<8x32xf32>
    %75 = arith.addf %70, %74 : vector<8x32xf32>
    %76 = math.tanh %75 : vector<8x32xf32>
    %77 = arith.subf %26, %76 : vector<8x32xf32>
    %78 = arith.mulf %69, %77 : vector<8x32xf32>
    %79 = arith.addf %76, %78 : vector<8x32xf32>
    %80 = arith.index_cast %28 : i32 to index
    %c0_38 = arith.constant 0 : index
    %81 = vector.load %arg11[%80, %c0_38] : memref<64x64xf32, #tpu.memory_space<vmem>>, vector<8x32xf32>
    tpu.vector_store %arg11[%80, %c0_38], %57 {strides = array<i32>} : memref<64x64xf32, #tpu.memory_space<vmem>>, vector<8x32xf32>,
    %82 = arith.index_cast %31 : i32 to index
    %c32 = arith.constant 32 : index
    %83 = vector.load %arg11[%82, %c32] : memref<64x64xf32, #tpu.memory_space<vmem>>, vector<8x32xf32>
    tpu.vector_store %arg11[%82, %c32], %79 {strides = array<i32>} : memref<64x64xf32, #tpu.memory_space<vmem>>, vector<8x32xf32>,
    %c1_i32 = arith.constant 1 : i32
    %c8_i32_39 = arith.constant 8 : i32
    %84 = arith.muli %c1_i32, %c8_i32_39 : i32
    %85 = tpu.assume_multiple %84, 8 : i32
    %c7_i32_40 = arith.constant 7 : i32
    %86 = arith.subi %c7_i32_40, %c1_i32 : i32
    %c8_i32_41 = arith.constant 8 : i32
    %87 = arith.muli %86, %c8_i32_41 : i32
    %88 = tpu.assume_multiple %87, 8 : i32
    %89 = arith.truncf %57 : vector<8x32xf32> to vector<8x32xbf16>
    %cst_42 = arith.constant dense<0.000000e+00> : vector<8x96xf32>
    %90 = tpu.matmul %89, %19, %cst_42 {dimension_numbers = #tpu.dot_dimension_numbers<[1], [0], [0], [1], [0, 0, 1, 1], [], []>} : vector<8x32xbf16>, vector<32x96xbf16>, vector<8x96xf32> -> vector<8x96xf32>
    %91 = arith.truncf %79 : vector<8x32xf32> to vector<8x32xbf16>
    %cst_43 = arith.constant dense<0.000000e+00> : vector<8x96xf32>
    %92 = tpu.matmul %91, %21, %cst_43 {dimension_numbers = #tpu.dot_dimension_numbers<[1], [0], [0], [1], [0, 0, 1, 1], [], []>} : vector<8x32xbf16>, vector<32x96xbf16>, vector<8x96xf32> -> vector<8x96xf32>
    %93 = arith.index_cast %85 : i32 to index
    %c0_44 = arith.constant 0 : index
    %94 = vector.load %arg9[%93, %c0_44] : memref<64x96xf32, #tpu.memory_space<vmem>>, vector<8x96xf32>
    %95 = vector.extract_strided_slice %94 {offsets = [0, 0], sizes = [8, 64], strides = [1, 1]} : vector<8x96xf32> to vector<8x64xf32>
    %96 = vector.extract_strided_slice %90 {offsets = [0, 0], sizes = [8, 64], strides = [1, 1]} : vector<8x96xf32> to vector<8x64xf32>
    %97 = arith.addf %95, %96 : vector<8x64xf32>
    %98 = arith.negf %97 : vector<8x64xf32>
    %99 = math.exp %98 : vector<8x64xf32>
    %cst_45 = arith.constant 1.000000e+00 : f32
    %100 = vector.broadcast %cst_45 : f32 to vector<8x64xf32>
    %101 = arith.addf %100, %99 : vector<8x64xf32>
    %102 = arith.divf %100, %101 : vector<8x64xf32>
    %103 = vector.extract_strided_slice %102 {offsets = [0, 0], sizes = [8, 32], strides = [1, 1]} : vector<8x64xf32> to vector<8x32xf32>
    %104 = vector.extract_strided_slice %102 {offsets = [0, 32], sizes = [8, 32], strides = [1, 1]} : vector<8x64xf32> to vector<8x32xf32>
    %105 = vector.extract_strided_slice %94 {offsets = [0, 64], sizes = [8, 32], strides = [1, 1]} : vector<8x96xf32> to vector<8x32xf32>
    %106 = vector.extract_strided_slice %90 {offsets = [0, 64], sizes = [8, 32], strides = [1, 1]} : vector<8x96xf32> to vector<8x32xf32>
    %107 = vector.broadcast %23 : vector<1x32xf32> to vector<8x32xf32>
    %108 = arith.addf %106, %107 : vector<8x32xf32>
    %109 = arith.mulf %103, %108 : vector<8x32xf32>
    %110 = arith.addf %105, %109 : vector<8x32xf32>
    %111 = math.tanh %110 : vector<8x32xf32>
    %112 = arith.subf %57, %111 : vector<8x32xf32>
    %113 = arith.mulf %104, %112 : vector<8x32xf32>
    %114 = arith.addf %111, %113 : vector<8x32xf32>
    %115 = arith.index_cast %88 : i32 to index
    %c0_46 = arith.constant 0 : index
    %116 = vector.load %arg10[%115, %c0_46] : memref<64x96xf32, #tpu.memory_space<vmem>>, vector<8x96xf32>
    %117 = vector.extract_strided_slice %116 {offsets = [0, 0], sizes = [8, 64], strides = [1, 1]} : vector<8x96xf32> to vector<8x64xf32>
    %118 = vector.extract_strided_slice %92 {offsets = [0, 0], sizes = [8, 64], strides = [1, 1]} : vector<8x96xf32> to vector<8x64xf32>
    %119 = arith.addf %117, %118 : vector<8x64xf32>
    %120 = arith.negf %119 : vector<8x64xf32>
    %121 = math.exp %120 : vector<8x64xf32>
    %cst_47 = arith.constant 1.000000e+00 : f32
    %122 = vector.broadcast %cst_47 : f32 to vector<8x64xf32>
    %123 = arith.addf %122, %121 : vector<8x64xf32>
    %124 = arith.divf %122, %123 : vector<8x64xf32>
    %125 = vector.extract_strided_slice %124 {offsets = [0, 0], sizes = [8, 32], strides = [1, 1]} : vector<8x64xf32> to vector<8x32xf32>
    %126 = vector.extract_strided_slice %124 {offsets = [0, 32], sizes = [8, 32], strides = [1, 1]} : vector<8x64xf32> to vector<8x32xf32>
    %127 = vector.extract_strided_slice %116 {offsets = [0, 64], sizes = [8, 32], strides = [1, 1]} : vector<8x96xf32> to vector<8x32xf32>
    %128 = vector.extract_strided_slice %92 {offsets = [0, 64], sizes = [8, 32], strides = [1, 1]} : vector<8x96xf32> to vector<8x32xf32>
    %129 = vector.broadcast %25 : vector<1x32xf32> to vector<8x32xf32>
    %130 = arith.addf %128, %129 : vector<8x32xf32>
    %131 = arith.mulf %125, %130 : vector<8x32xf32>
    %132 = arith.addf %127, %131 : vector<8x32xf32>
    %133 = math.tanh %132 : vector<8x32xf32>
    %134 = arith.subf %79, %133 : vector<8x32xf32>
    %135 = arith.mulf %126, %134 : vector<8x32xf32>
    %136 = arith.addf %133, %135 : vector<8x32xf32>
    %137 = arith.index_cast %85 : i32 to index
    %c0_48 = arith.constant 0 : index
    %138 = vector.load %arg11[%137, %c0_48] : memref<64x64xf32, #tpu.memory_space<vmem>>, vector<8x32xf32>
    tpu.vector_store %arg11[%137, %c0_48], %114 {strides = array<i32>} : memref<64x64xf32, #tpu.memory_space<vmem>>, vector<8x32xf32>,
    %139 = arith.index_cast %88 : i32 to index
    %c32_49 = arith.constant 32 : index
    %140 = vector.load %arg11[%139, %c32_49] : memref<64x64xf32, #tpu.memory_space<vmem>>, vector<8x32xf32>
    tpu.vector_store %arg11[%139, %c32_49], %136 {strides = array<i32>} : memref<64x64xf32, #tpu.memory_space<vmem>>, vector<8x32xf32>,
    %c2_i32 = arith.constant 2 : i32
    %c8_i32_50 = arith.constant 8 : i32
    %141 = arith.muli %c2_i32, %c8_i32_50 : i32
    %142 = tpu.assume_multiple %141, 8 : i32
    %c7_i32_51 = arith.constant 7 : i32
    %143 = arith.subi %c7_i32_51, %c2_i32 : i32
    %c8_i32_52 = arith.constant 8 : i32
    %144 = arith.muli %143, %c8_i32_52 : i32
    %145 = tpu.assume_multiple %144, 8 : i32
    %146 = arith.truncf %114 : vector<8x32xf32> to vector<8x32xbf16>
    %cst_53 = arith.constant dense<0.000000e+00> : vector<8x96xf32>
    %147 = tpu.matmul %146, %19, %cst_53 {dimension_numbers = #tpu.dot_dimension_numbers<[1], [0], [0], [1], [0, 0, 1, 1], [], []>} : vector<8x32xbf16>, vector<32x96xbf16>, vector<8x96xf32> -> vector<8x96xf32>
    %148 = arith.truncf %136 : vector<8x32xf32> to vector<8x32xbf16>
    %cst_54 = arith.constant dense<0.000000e+00> : vector<8x96xf32>
    %149 = tpu.matmul %148, %21, %cst_54 {dimension_numbers = #tpu.dot_dimension_numbers<[1], [0], [0], [1], [0, 0, 1, 1], [], []>} : vector<8x32xbf16>, vector<32x96xbf16>, vector<8x96xf32> -> vector<8x96xf32>
    %150 = arith.index_cast %142 : i32 to index
    %c0_55 = arith.constant 0 : index
    %151 = vector.load %arg9[%150, %c0_55] : memref<64x96xf32, #tpu.memory_space<vmem>>, vector<8x96xf32>
    %152 = vector.extract_strided_slice %151 {offsets = [0, 0], sizes = [8, 64], strides = [1, 1]} : vector<8x96xf32> to vector<8x64xf32>
    %153 = vector.extract_strided_slice %147 {offsets = [0, 0], sizes = [8, 64], strides = [1, 1]} : vector<8x96xf32> to vector<8x64xf32>
    %154 = arith.addf %152, %153 : vector<8x64xf32>
    %155 = arith.negf %154 : vector<8x64xf32>
    %156 = math.exp %155 : vector<8x64xf32>
    %cst_56 = arith.constant 1.000000e+00 : f32
    %157 = vector.broadcast %cst_56 : f32 to vector<8x64xf32>
    %158 = arith.addf %157, %156 : vector<8x64xf32>
    %159 = arith.divf %157, %158 : vector<8x64xf32>
    %160 = vector.extract_strided_slice %159 {offsets = [0, 0], sizes = [8, 32], strides = [1, 1]} : vector<8x64xf32> to vector<8x32xf32>
    %161 = vector.extract_strided_slice %159 {offsets = [0, 32], sizes = [8, 32], strides = [1, 1]} : vector<8x64xf32> to vector<8x32xf32>
    %162 = vector.extract_strided_slice %151 {offsets = [0, 64], sizes = [8, 32], strides = [1, 1]} : vector<8x96xf32> to vector<8x32xf32>
    %163 = vector.extract_strided_slice %147 {offsets = [0, 64], sizes = [8, 32], strides = [1, 1]} : vector<8x96xf32> to vector<8x32xf32>
    %164 = vector.broadcast %23 : vector<1x32xf32> to vector<8x32xf32>
    %165 = arith.addf %163, %164 : vector<8x32xf32>
    %166 = arith.mulf %160, %165 : vector<8x32xf32>
    %167 = arith.addf %162, %166 : vector<8x32xf32>
    %168 = math.tanh %167 : vector<8x32xf32>
    %169 = arith.subf %114, %168 : vector<8x32xf32>
    %170 = arith.mulf %161, %169 : vector<8x32xf32>
    %171 = arith.addf %168, %170 : vector<8x32xf32>
    %172 = arith.index_cast %145 : i32 to index
    %c0_57 = arith.constant 0 : index
    %173 = vector.load %arg10[%172, %c0_57] : memref<64x96xf32, #tpu.memory_space<vmem>>, vector<8x96xf32>
    %174 = vector.extract_strided_slice %173 {offsets = [0, 0], sizes = [8, 64], strides = [1, 1]} : vector<8x96xf32> to vector<8x64xf32>
    %175 = vector.extract_strided_slice %149 {offsets = [0, 0], sizes = [8, 64], strides = [1, 1]} : vector<8x96xf32> to vector<8x64xf32>
    %176 = arith.addf %174, %175 : vector<8x64xf32>
    %177 = arith.negf %176 : vector<8x64xf32>
    %178 = math.exp %177 : vector<8x64xf32>
    %cst_58 = arith.constant 1.000000e+00 : f32
    %179 = vector.broadcast %cst_58 : f32 to vector<8x64xf32>
    %180 = arith.addf %179, %178 : vector<8x64xf32>
    %181 = arith.divf %179, %180 : vector<8x64xf32>
    %182 = vector.extract_strided_slice %181 {offsets = [0, 0], sizes = [8, 32], strides = [1, 1]} : vector<8x64xf32> to vector<8x32xf32>
    %183 = vector.extract_strided_slice %181 {offsets = [0, 32], sizes = [8, 32], strides = [1, 1]} : vector<8x64xf32> to vector<8x32xf32>
    %184 = vector.extract_strided_slice %173 {offsets = [0, 64], sizes = [8, 32], strides = [1, 1]} : vector<8x96xf32> to vector<8x32xf32>
    %185 = vector.extract_strided_slice %149 {offsets = [0, 64], sizes = [8, 32], strides = [1, 1]} : vector<8x96xf32> to vector<8x32xf32>
    %186 = vector.broadcast %25 : vector<1x32xf32> to vector<8x32xf32>
    %187 = arith.addf %185, %186 : vector<8x32xf32>
    %188 = arith.mulf %182, %187 : vector<8x32xf32>
    %189 = arith.addf %184, %188 : vector<8x32xf32>
    %190 = math.tanh %189 : vector<8x32xf32>
    %191 = arith.subf %136, %190 : vector<8x32xf32>
    %192 = arith.mulf %183, %191 : vector<8x32xf32>
    %193 = arith.addf %190, %192 : vector<8x32xf32>
    %194 = arith.index_cast %142 : i32 to index
    %c0_59 = arith.constant 0 : index
    %195 = vector.load %arg11[%194, %c0_59] : memref<64x64xf32, #tpu.memory_space<vmem>>, vector<8x32xf32>
    tpu.vector_store %arg11[%194, %c0_59], %171 {strides = array<i32>} : memref<64x64xf32, #tpu.memory_space<vmem>>, vector<8x32xf32>,
    %196 = arith.index_cast %145 : i32 to index
    %c32_60 = arith.constant 32 : index
    %197 = vector.load %arg11[%196, %c32_60] : memref<64x64xf32, #tpu.memory_space<vmem>>, vector<8x32xf32>
    tpu.vector_store %arg11[%196, %c32_60], %193 {strides = array<i32>} : memref<64x64xf32, #tpu.memory_space<vmem>>, vector<8x32xf32>,
    %c3_i32 = arith.constant 3 : i32
    %c8_i32_61 = arith.constant 8 : i32
    %198 = arith.muli %c3_i32, %c8_i32_61 : i32
    %199 = tpu.assume_multiple %198, 8 : i32
    %c7_i32_62 = arith.constant 7 : i32
    %200 = arith.subi %c7_i32_62, %c3_i32 : i32
    %c8_i32_63 = arith.constant 8 : i32
    %201 = arith.muli %200, %c8_i32_63 : i32
    %202 = tpu.assume_multiple %201, 8 : i32
    %203 = arith.truncf %171 : vector<8x32xf32> to vector<8x32xbf16>
    %cst_64 = arith.constant dense<0.000000e+00> : vector<8x96xf32>
    %204 = tpu.matmul %203, %19, %cst_64 {dimension_numbers = #tpu.dot_dimension_numbers<[1], [0], [0], [1], [0, 0, 1, 1], [], []>} : vector<8x32xbf16>, vector<32x96xbf16>, vector<8x96xf32> -> vector<8x96xf32>
    %205 = arith.truncf %193 : vector<8x32xf32> to vector<8x32xbf16>
    %cst_65 = arith.constant dense<0.000000e+00> : vector<8x96xf32>
    %206 = tpu.matmul %205, %21, %cst_65 {dimension_numbers = #tpu.dot_dimension_numbers<[1], [0], [0], [1], [0, 0, 1, 1], [], []>} : vector<8x32xbf16>, vector<32x96xbf16>, vector<8x96xf32> -> vector<8x96xf32>
    %207 = arith.index_cast %199 : i32 to index
    %c0_66 = arith.constant 0 : index
    %208 = vector.load %arg9[%207, %c0_66] : memref<64x96xf32, #tpu.memory_space<vmem>>, vector<8x96xf32>
    %209 = vector.extract_strided_slice %208 {offsets = [0, 0], sizes = [8, 64], strides = [1, 1]} : vector<8x96xf32> to vector<8x64xf32>
    %210 = vector.extract_strided_slice %204 {offsets = [0, 0], sizes = [8, 64], strides = [1, 1]} : vector<8x96xf32> to vector<8x64xf32>
    %211 = arith.addf %209, %210 : vector<8x64xf32>
    %212 = arith.negf %211 : vector<8x64xf32>
    %213 = math.exp %212 : vector<8x64xf32>
    %cst_67 = arith.constant 1.000000e+00 : f32
    %214 = vector.broadcast %cst_67 : f32 to vector<8x64xf32>
    %215 = arith.addf %214, %213 : vector<8x64xf32>
    %216 = arith.divf %214, %215 : vector<8x64xf32>
    %217 = vector.extract_strided_slice %216 {offsets = [0, 0], sizes = [8, 32], strides = [1, 1]} : vector<8x64xf32> to vector<8x32xf32>
    %218 = vector.extract_strided_slice %216 {offsets = [0, 32], sizes = [8, 32], strides = [1, 1]} : vector<8x64xf32> to vector<8x32xf32>
    %219 = vector.extract_strided_slice %208 {offsets = [0, 64], sizes = [8, 32], strides = [1, 1]} : vector<8x96xf32> to vector<8x32xf32>
    %220 = vector.extract_strided_slice %204 {offsets = [0, 64], sizes = [8, 32], strides = [1, 1]} : vector<8x96xf32> to vector<8x32xf32>
    %221 = vector.broadcast %23 : vector<1x32xf32> to vector<8x32xf32>
    %222 = arith.addf %220, %221 : vector<8x32xf32>
    %223 = arith.mulf %217, %222 : vector<8x32xf32>
    %224 = arith.addf %219, %223 : vector<8x32xf32>
    %225 = math.tanh %224 : vector<8x32xf32>
    %226 = arith.subf %171, %225 : vector<8x32xf32>
    %227 = arith.mulf %218, %226 : vector<8x32xf32>
    %228 = arith.addf %225, %227 : vector<8x32xf32>
    %229 = arith.index_cast %202 : i32 to index
    %c0_68 = arith.constant 0 : index
    %230 = vector.load %arg10[%229, %c0_68] : memref<64x96xf32, #tpu.memory_space<vmem>>, vector<8x96xf32>
    %231 = vector.extract_strided_slice %230 {offsets = [0, 0], sizes = [8, 64], strides = [1, 1]} : vector<8x96xf32> to vector<8x64xf32>
    %232 = vector.extract_strided_slice %206 {offsets = [0, 0], sizes = [8, 64], strides = [1, 1]} : vector<8x96xf32> to vector<8x64xf32>
    %233 = arith.addf %231, %232 : vector<8x64xf32>
    %234 = arith.negf %233 : vector<8x64xf32>
    %235 = math.exp %234 : vector<8x64xf32>
    %cst_69 = arith.constant 1.000000e+00 : f32
    %236 = vector.broadcast %cst_69 : f32 to vector<8x64xf32>
    %237 = arith.addf %236, %235 : vector<8x64xf32>
    %238 = arith.divf %236, %237 : vector<8x64xf32>
    %239 = vector.extract_strided_slice %238 {offsets = [0, 0], sizes = [8, 32], strides = [1, 1]} : vector<8x64xf32> to vector<8x32xf32>
    %240 = vector.extract_strided_slice %238 {offsets = [0, 32], sizes = [8, 32], strides = [1, 1]} : vector<8x64xf32> to vector<8x32xf32>
    %241 = vector.extract_strided_slice %230 {offsets = [0, 64], sizes = [8, 32], strides = [1, 1]} : vector<8x96xf32> to vector<8x32xf32>
    %242 = vector.extract_strided_slice %206 {offsets = [0, 64], sizes = [8, 32], strides = [1, 1]} : vector<8x96xf32> to vector<8x32xf32>
    %243 = vector.broadcast %25 : vector<1x32xf32> to vector<8x32xf32>
    %244 = arith.addf %242, %243 : vector<8x32xf32>
    %245 = arith.mulf %239, %244 : vector<8x32xf32>
    %246 = arith.addf %241, %245 : vector<8x32xf32>
    %247 = math.tanh %246 : vector<8x32xf32>
    %248 = arith.subf %193, %247 : vector<8x32xf32>
    %249 = arith.mulf %240, %248 : vector<8x32xf32>
    %250 = arith.addf %247, %249 : vector<8x32xf32>
    %251 = arith.index_cast %199 : i32 to index
    %c0_70 = arith.constant 0 : index
    %252 = vector.load %arg11[%251, %c0_70] : memref<64x64xf32, #tpu.memory_space<vmem>>, vector<8x32xf32>
    tpu.vector_store %arg11[%251, %c0_70], %228 {strides = array<i32>} : memref<64x64xf32, #tpu.memory_space<vmem>>, vector<8x32xf32>,
    %253 = arith.index_cast %202 : i32 to index
    %c32_71 = arith.constant 32 : index
    %254 = vector.load %arg11[%253, %c32_71] : memref<64x64xf32, #tpu.memory_space<vmem>>, vector<8x32xf32>
    tpu.vector_store %arg11[%253, %c32_71], %250 {strides = array<i32>} : memref<64x64xf32, #tpu.memory_space<vmem>>, vector<8x32xf32>,
    %c4_i32 = arith.constant 4 : i32
    %c8_i32_72 = arith.constant 8 : i32
    %255 = arith.muli %c4_i32, %c8_i32_72 : i32
    %256 = tpu.assume_multiple %255, 8 : i32
    %c7_i32_73 = arith.constant 7 : i32
    %257 = arith.subi %c7_i32_73, %c4_i32 : i32
    %c8_i32_74 = arith.constant 8 : i32
    %258 = arith.muli %257, %c8_i32_74 : i32
    %259 = tpu.assume_multiple %258, 8 : i32
    %260 = arith.truncf %228 : vector<8x32xf32> to vector<8x32xbf16>
    %cst_75 = arith.constant dense<0.000000e+00> : vector<8x96xf32>
    %261 = tpu.matmul %260, %19, %cst_75 {dimension_numbers = #tpu.dot_dimension_numbers<[1], [0], [0], [1], [0, 0, 1, 1], [], []>} : vector<8x32xbf16>, vector<32x96xbf16>, vector<8x96xf32> -> vector<8x96xf32>
    %262 = arith.truncf %250 : vector<8x32xf32> to vector<8x32xbf16>
    %cst_76 = arith.constant dense<0.000000e+00> : vector<8x96xf32>
    %263 = tpu.matmul %262, %21, %cst_76 {dimension_numbers = #tpu.dot_dimension_numbers<[1], [0], [0], [1], [0, 0, 1, 1], [], []>} : vector<8x32xbf16>, vector<32x96xbf16>, vector<8x96xf32> -> vector<8x96xf32>
    %264 = arith.index_cast %256 : i32 to index
    %c0_77 = arith.constant 0 : index
    %265 = vector.load %arg9[%264, %c0_77] : memref<64x96xf32, #tpu.memory_space<vmem>>, vector<8x96xf32>
    %266 = vector.extract_strided_slice %265 {offsets = [0, 0], sizes = [8, 64], strides = [1, 1]} : vector<8x96xf32> to vector<8x64xf32>
    %267 = vector.extract_strided_slice %261 {offsets = [0, 0], sizes = [8, 64], strides = [1, 1]} : vector<8x96xf32> to vector<8x64xf32>
    %268 = arith.addf %266, %267 : vector<8x64xf32>
    %269 = arith.negf %268 : vector<8x64xf32>
    %270 = math.exp %269 : vector<8x64xf32>
    %cst_78 = arith.constant 1.000000e+00 : f32
    %271 = vector.broadcast %cst_78 : f32 to vector<8x64xf32>
    %272 = arith.addf %271, %270 : vector<8x64xf32>
    %273 = arith.divf %271, %272 : vector<8x64xf32>
    %274 = vector.extract_strided_slice %273 {offsets = [0, 0], sizes = [8, 32], strides = [1, 1]} : vector<8x64xf32> to vector<8x32xf32>
    %275 = vector.extract_strided_slice %273 {offsets = [0, 32], sizes = [8, 32], strides = [1, 1]} : vector<8x64xf32> to vector<8x32xf32>
    %276 = vector.extract_strided_slice %265 {offsets = [0, 64], sizes = [8, 32], strides = [1, 1]} : vector<8x96xf32> to vector<8x32xf32>
    %277 = vector.extract_strided_slice %261 {offsets = [0, 64], sizes = [8, 32], strides = [1, 1]} : vector<8x96xf32> to vector<8x32xf32>
    %278 = vector.broadcast %23 : vector<1x32xf32> to vector<8x32xf32>
    %279 = arith.addf %277, %278 : vector<8x32xf32>
    %280 = arith.mulf %274, %279 : vector<8x32xf32>
    %281 = arith.addf %276, %280 : vector<8x32xf32>
    %282 = math.tanh %281 : vector<8x32xf32>
    %283 = arith.subf %228, %282 : vector<8x32xf32>
    %284 = arith.mulf %275, %283 : vector<8x32xf32>
    %285 = arith.addf %282, %284 : vector<8x32xf32>
    %286 = arith.index_cast %259 : i32 to index
    %c0_79 = arith.constant 0 : index
    %287 = vector.load %arg10[%286, %c0_79] : memref<64x96xf32, #tpu.memory_space<vmem>>, vector<8x96xf32>
    %288 = vector.extract_strided_slice %287 {offsets = [0, 0], sizes = [8, 64], strides = [1, 1]} : vector<8x96xf32> to vector<8x64xf32>
    %289 = vector.extract_strided_slice %263 {offsets = [0, 0], sizes = [8, 64], strides = [1, 1]} : vector<8x96xf32> to vector<8x64xf32>
    %290 = arith.addf %288, %289 : vector<8x64xf32>
    %291 = arith.negf %290 : vector<8x64xf32>
    %292 = math.exp %291 : vector<8x64xf32>
    %cst_80 = arith.constant 1.000000e+00 : f32
    %293 = vector.broadcast %cst_80 : f32 to vector<8x64xf32>
    %294 = arith.addf %293, %292 : vector<8x64xf32>
    %295 = arith.divf %293, %294 : vector<8x64xf32>
    %296 = vector.extract_strided_slice %295 {offsets = [0, 0], sizes = [8, 32], strides = [1, 1]} : vector<8x64xf32> to vector<8x32xf32>
    %297 = vector.extract_strided_slice %295 {offsets = [0, 32], sizes = [8, 32], strides = [1, 1]} : vector<8x64xf32> to vector<8x32xf32>
    %298 = vector.extract_strided_slice %287 {offsets = [0, 64], sizes = [8, 32], strides = [1, 1]} : vector<8x96xf32> to vector<8x32xf32>
    %299 = vector.extract_strided_slice %263 {offsets = [0, 64], sizes = [8, 32], strides = [1, 1]} : vector<8x96xf32> to vector<8x32xf32>
    %300 = vector.broadcast %25 : vector<1x32xf32> to vector<8x32xf32>
    %301 = arith.addf %299, %300 : vector<8x32xf32>
    %302 = arith.mulf %296, %301 : vector<8x32xf32>
    %303 = arith.addf %298, %302 : vector<8x32xf32>
    %304 = math.tanh %303 : vector<8x32xf32>
    %305 = arith.subf %250, %304 : vector<8x32xf32>
    %306 = arith.mulf %297, %305 : vector<8x32xf32>
    %307 = arith.addf %304, %306 : vector<8x32xf32>
    %308 = arith.index_cast %256 : i32 to index
    %c0_81 = arith.constant 0 : index
    %309 = vector.load %arg11[%308, %c0_81] : memref<64x64xf32, #tpu.memory_space<vmem>>, vector<8x32xf32>
    tpu.vector_store %arg11[%308, %c0_81], %285 {strides = array<i32>} : memref<64x64xf32, #tpu.memory_space<vmem>>, vector<8x32xf32>,
    %310 = arith.index_cast %259 : i32 to index
    %c32_82 = arith.constant 32 : index
    %311 = vector.load %arg11[%310, %c32_82] : memref<64x64xf32, #tpu.memory_space<vmem>>, vector<8x32xf32>
    tpu.vector_store %arg11[%310, %c32_82], %307 {strides = array<i32>} : memref<64x64xf32, #tpu.memory_space<vmem>>, vector<8x32xf32>,
    %c5_i32 = arith.constant 5 : i32
    %c8_i32_83 = arith.constant 8 : i32
    %312 = arith.muli %c5_i32, %c8_i32_83 : i32
    %313 = tpu.assume_multiple %312, 8 : i32
    %c7_i32_84 = arith.constant 7 : i32
    %314 = arith.subi %c7_i32_84, %c5_i32 : i32
    %c8_i32_85 = arith.constant 8 : i32
    %315 = arith.muli %314, %c8_i32_85 : i32
    %316 = tpu.assume_multiple %315, 8 : i32
    %317 = arith.truncf %285 : vector<8x32xf32> to vector<8x32xbf16>
    %cst_86 = arith.constant dense<0.000000e+00> : vector<8x96xf32>
    %318 = tpu.matmul %317, %19, %cst_86 {dimension_numbers = #tpu.dot_dimension_numbers<[1], [0], [0], [1], [0, 0, 1, 1], [], []>} : vector<8x32xbf16>, vector<32x96xbf16>, vector<8x96xf32> -> vector<8x96xf32>
    %319 = arith.truncf %307 : vector<8x32xf32> to vector<8x32xbf16>
    %cst_87 = arith.constant dense<0.000000e+00> : vector<8x96xf32>
    %320 = tpu.matmul %319, %21, %cst_87 {dimension_numbers = #tpu.dot_dimension_numbers<[1], [0], [0], [1], [0, 0, 1, 1], [], []>} : vector<8x32xbf16>, vector<32x96xbf16>, vector<8x96xf32> -> vector<8x96xf32>
    %321 = arith.index_cast %313 : i32 to index
    %c0_88 = arith.constant 0 : index
    %322 = vector.load %arg9[%321, %c0_88] : memref<64x96xf32, #tpu.memory_space<vmem>>, vector<8x96xf32>
    %323 = vector.extract_strided_slice %322 {offsets = [0, 0], sizes = [8, 64], strides = [1, 1]} : vector<8x96xf32> to vector<8x64xf32>
    %324 = vector.extract_strided_slice %318 {offsets = [0, 0], sizes = [8, 64], strides = [1, 1]} : vector<8x96xf32> to vector<8x64xf32>
    %325 = arith.addf %323, %324 : vector<8x64xf32>
    %326 = arith.negf %325 : vector<8x64xf32>
    %327 = math.exp %326 : vector<8x64xf32>
    %cst_89 = arith.constant 1.000000e+00 : f32
    %328 = vector.broadcast %cst_89 : f32 to vector<8x64xf32>
    %329 = arith.addf %328, %327 : vector<8x64xf32>
    %330 = arith.divf %328, %329 : vector<8x64xf32>
    %331 = vector.extract_strided_slice %330 {offsets = [0, 0], sizes = [8, 32], strides = [1, 1]} : vector<8x64xf32> to vector<8x32xf32>
    %332 = vector.extract_strided_slice %330 {offsets = [0, 32], sizes = [8, 32], strides = [1, 1]} : vector<8x64xf32> to vector<8x32xf32>
    %333 = vector.extract_strided_slice %322 {offsets = [0, 64], sizes = [8, 32], strides = [1, 1]} : vector<8x96xf32> to vector<8x32xf32>
    %334 = vector.extract_strided_slice %318 {offsets = [0, 64], sizes = [8, 32], strides = [1, 1]} : vector<8x96xf32> to vector<8x32xf32>
    %335 = vector.broadcast %23 : vector<1x32xf32> to vector<8x32xf32>
    %336 = arith.addf %334, %335 : vector<8x32xf32>
    %337 = arith.mulf %331, %336 : vector<8x32xf32>
    %338 = arith.addf %333, %337 : vector<8x32xf32>
    %339 = math.tanh %338 : vector<8x32xf32>
    %340 = arith.subf %285, %339 : vector<8x32xf32>
    %341 = arith.mulf %332, %340 : vector<8x32xf32>
    %342 = arith.addf %339, %341 : vector<8x32xf32>
    %343 = arith.index_cast %316 : i32 to index
    %c0_90 = arith.constant 0 : index
    %344 = vector.load %arg10[%343, %c0_90] : memref<64x96xf32, #tpu.memory_space<vmem>>, vector<8x96xf32>
    %345 = vector.extract_strided_slice %344 {offsets = [0, 0], sizes = [8, 64], strides = [1, 1]} : vector<8x96xf32> to vector<8x64xf32>
    %346 = vector.extract_strided_slice %320 {offsets = [0, 0], sizes = [8, 64], strides = [1, 1]} : vector<8x96xf32> to vector<8x64xf32>
    %347 = arith.addf %345, %346 : vector<8x64xf32>
    %348 = arith.negf %347 : vector<8x64xf32>
    %349 = math.exp %348 : vector<8x64xf32>
    %cst_91 = arith.constant 1.000000e+00 : f32
    %350 = vector.broadcast %cst_91 : f32 to vector<8x64xf32>
    %351 = arith.addf %350, %349 : vector<8x64xf32>
    %352 = arith.divf %350, %351 : vector<8x64xf32>
    %353 = vector.extract_strided_slice %352 {offsets = [0, 0], sizes = [8, 32], strides = [1, 1]} : vector<8x64xf32> to vector<8x32xf32>
    %354 = vector.extract_strided_slice %352 {offsets = [0, 32], sizes = [8, 32], strides = [1, 1]} : vector<8x64xf32> to vector<8x32xf32>
    %355 = vector.extract_strided_slice %344 {offsets = [0, 64], sizes = [8, 32], strides = [1, 1]} : vector<8x96xf32> to vector<8x32xf32>
    %356 = vector.extract_strided_slice %320 {offsets = [0, 64], sizes = [8, 32], strides = [1, 1]} : vector<8x96xf32> to vector<8x32xf32>
    %357 = vector.broadcast %25 : vector<1x32xf32> to vector<8x32xf32>
    %358 = arith.addf %356, %357 : vector<8x32xf32>
    %359 = arith.mulf %353, %358 : vector<8x32xf32>
    %360 = arith.addf %355, %359 : vector<8x32xf32>
    %361 = math.tanh %360 : vector<8x32xf32>
    %362 = arith.subf %307, %361 : vector<8x32xf32>
    %363 = arith.mulf %354, %362 : vector<8x32xf32>
    %364 = arith.addf %361, %363 : vector<8x32xf32>
    %365 = arith.index_cast %313 : i32 to index
    %c0_92 = arith.constant 0 : index
    %366 = vector.load %arg11[%365, %c0_92] : memref<64x64xf32, #tpu.memory_space<vmem>>, vector<8x32xf32>
    tpu.vector_store %arg11[%365, %c0_92], %342 {strides = array<i32>} : memref<64x64xf32, #tpu.memory_space<vmem>>, vector<8x32xf32>,
    %367 = arith.index_cast %316 : i32 to index
    %c32_93 = arith.constant 32 : index
    %368 = vector.load %arg11[%367, %c32_93] : memref<64x64xf32, #tpu.memory_space<vmem>>, vector<8x32xf32>
    tpu.vector_store %arg11[%367, %c32_93], %364 {strides = array<i32>} : memref<64x64xf32, #tpu.memory_space<vmem>>, vector<8x32xf32>,
    %c6_i32 = arith.constant 6 : i32
    %c8_i32_94 = arith.constant 8 : i32
    %369 = arith.muli %c6_i32, %c8_i32_94 : i32
    %370 = tpu.assume_multiple %369, 8 : i32
    %c7_i32_95 = arith.constant 7 : i32
    %371 = arith.subi %c7_i32_95, %c6_i32 : i32
    %c8_i32_96 = arith.constant 8 : i32
    %372 = arith.muli %371, %c8_i32_96 : i32
    %373 = tpu.assume_multiple %372, 8 : i32
    %374 = arith.truncf %342 : vector<8x32xf32> to vector<8x32xbf16>
    %cst_97 = arith.constant dense<0.000000e+00> : vector<8x96xf32>
    %375 = tpu.matmul %374, %19, %cst_97 {dimension_numbers = #tpu.dot_dimension_numbers<[1], [0], [0], [1], [0, 0, 1, 1], [], []>} : vector<8x32xbf16>, vector<32x96xbf16>, vector<8x96xf32> -> vector<8x96xf32>
    %376 = arith.truncf %364 : vector<8x32xf32> to vector<8x32xbf16>
    %cst_98 = arith.constant dense<0.000000e+00> : vector<8x96xf32>
    %377 = tpu.matmul %376, %21, %cst_98 {dimension_numbers = #tpu.dot_dimension_numbers<[1], [0], [0], [1], [0, 0, 1, 1], [], []>} : vector<8x32xbf16>, vector<32x96xbf16>, vector<8x96xf32> -> vector<8x96xf32>
    %378 = arith.index_cast %370 : i32 to index
    %c0_99 = arith.constant 0 : index
    %379 = vector.load %arg9[%378, %c0_99] : memref<64x96xf32, #tpu.memory_space<vmem>>, vector<8x96xf32>
    %380 = vector.extract_strided_slice %379 {offsets = [0, 0], sizes = [8, 64], strides = [1, 1]} : vector<8x96xf32> to vector<8x64xf32>
    %381 = vector.extract_strided_slice %375 {offsets = [0, 0], sizes = [8, 64], strides = [1, 1]} : vector<8x96xf32> to vector<8x64xf32>
    %382 = arith.addf %380, %381 : vector<8x64xf32>
    %383 = arith.negf %382 : vector<8x64xf32>
    %384 = math.exp %383 : vector<8x64xf32>
    %cst_100 = arith.constant 1.000000e+00 : f32
    %385 = vector.broadcast %cst_100 : f32 to vector<8x64xf32>
    %386 = arith.addf %385, %384 : vector<8x64xf32>
    %387 = arith.divf %385, %386 : vector<8x64xf32>
    %388 = vector.extract_strided_slice %387 {offsets = [0, 0], sizes = [8, 32], strides = [1, 1]} : vector<8x64xf32> to vector<8x32xf32>
    %389 = vector.extract_strided_slice %387 {offsets = [0, 32], sizes = [8, 32], strides = [1, 1]} : vector<8x64xf32> to vector<8x32xf32>
    %390 = vector.extract_strided_slice %379 {offsets = [0, 64], sizes = [8, 32], strides = [1, 1]} : vector<8x96xf32> to vector<8x32xf32>
    %391 = vector.extract_strided_slice %375 {offsets = [0, 64], sizes = [8, 32], strides = [1, 1]} : vector<8x96xf32> to vector<8x32xf32>
    %392 = vector.broadcast %23 : vector<1x32xf32> to vector<8x32xf32>
    %393 = arith.addf %391, %392 : vector<8x32xf32>
    %394 = arith.mulf %388, %393 : vector<8x32xf32>
    %395 = arith.addf %390, %394 : vector<8x32xf32>
    %396 = math.tanh %395 : vector<8x32xf32>
    %397 = arith.subf %342, %396 : vector<8x32xf32>
    %398 = arith.mulf %389, %397 : vector<8x32xf32>
    %399 = arith.addf %396, %398 : vector<8x32xf32>
    %400 = arith.index_cast %373 : i32 to index
    %c0_101 = arith.constant 0 : index
    %401 = vector.load %arg10[%400, %c0_101] : memref<64x96xf32, #tpu.memory_space<vmem>>, vector<8x96xf32>
    %402 = vector.extract_strided_slice %401 {offsets = [0, 0], sizes = [8, 64], strides = [1, 1]} : vector<8x96xf32> to vector<8x64xf32>
    %403 = vector.extract_strided_slice %377 {offsets = [0, 0], sizes = [8, 64], strides = [1, 1]} : vector<8x96xf32> to vector<8x64xf32>
    %404 = arith.addf %402, %403 : vector<8x64xf32>
    %405 = arith.negf %404 : vector<8x64xf32>
    %406 = math.exp %405 : vector<8x64xf32>
    %cst_102 = arith.constant 1.000000e+00 : f32
    %407 = vector.broadcast %cst_102 : f32 to vector<8x64xf32>
    %408 = arith.addf %407, %406 : vector<8x64xf32>
    %409 = arith.divf %407, %408 : vector<8x64xf32>
    %410 = vector.extract_strided_slice %409 {offsets = [0, 0], sizes = [8, 32], strides = [1, 1]} : vector<8x64xf32> to vector<8x32xf32>
    %411 = vector.extract_strided_slice %409 {offsets = [0, 32], sizes = [8, 32], strides = [1, 1]} : vector<8x64xf32> to vector<8x32xf32>
    %412 = vector.extract_strided_slice %401 {offsets = [0, 64], sizes = [8, 32], strides = [1, 1]} : vector<8x96xf32> to vector<8x32xf32>
    %413 = vector.extract_strided_slice %377 {offsets = [0, 64], sizes = [8, 32], strides = [1, 1]} : vector<8x96xf32> to vector<8x32xf32>
    %414 = vector.broadcast %25 : vector<1x32xf32> to vector<8x32xf32>
    %415 = arith.addf %413, %414 : vector<8x32xf32>
    %416 = arith.mulf %410, %415 : vector<8x32xf32>
    %417 = arith.addf %412, %416 : vector<8x32xf32>
    %418 = math.tanh %417 : vector<8x32xf32>
    %419 = arith.subf %364, %418 : vector<8x32xf32>
    %420 = arith.mulf %411, %419 : vector<8x32xf32>
    %421 = arith.addf %418, %420 : vector<8x32xf32>
    %422 = arith.index_cast %370 : i32 to index
    %c0_103 = arith.constant 0 : index
    %423 = vector.load %arg11[%422, %c0_103] : memref<64x64xf32, #tpu.memory_space<vmem>>, vector<8x32xf32>
    tpu.vector_store %arg11[%422, %c0_103], %399 {strides = array<i32>} : memref<64x64xf32, #tpu.memory_space<vmem>>, vector<8x32xf32>,
    %424 = arith.index_cast %373 : i32 to index
    %c32_104 = arith.constant 32 : index
    %425 = vector.load %arg11[%424, %c32_104] : memref<64x64xf32, #tpu.memory_space<vmem>>, vector<8x32xf32>
    tpu.vector_store %arg11[%424, %c32_104], %421 {strides = array<i32>} : memref<64x64xf32, #tpu.memory_space<vmem>>, vector<8x32xf32>,
    %c7_i32_105 = arith.constant 7 : i32
    %c8_i32_106 = arith.constant 8 : i32
    %426 = arith.muli %c7_i32_105, %c8_i32_106 : i32
    %427 = tpu.assume_multiple %426, 8 : i32
    %c7_i32_107 = arith.constant 7 : i32
    %428 = arith.subi %c7_i32_107, %c7_i32_105 : i32
    %c8_i32_108 = arith.constant 8 : i32
    %429 = arith.muli %428, %c8_i32_108 : i32
    %430 = tpu.assume_multiple %429, 8 : i32
    %431 = arith.truncf %399 : vector<8x32xf32> to vector<8x32xbf16>
    %cst_109 = arith.constant dense<0.000000e+00> : vector<8x96xf32>
    %432 = tpu.matmul %431, %19, %cst_109 {dimension_numbers = #tpu.dot_dimension_numbers<[1], [0], [0], [1], [0, 0, 1, 1], [], []>} : vector<8x32xbf16>, vector<32x96xbf16>, vector<8x96xf32> -> vector<8x96xf32>
    %433 = arith.truncf %421 : vector<8x32xf32> to vector<8x32xbf16>
    %cst_110 = arith.constant dense<0.000000e+00> : vector<8x96xf32>
    %434 = tpu.matmul %433, %21, %cst_110 {dimension_numbers = #tpu.dot_dimension_numbers<[1], [0], [0], [1], [0, 0, 1, 1], [], []>} : vector<8x32xbf16>, vector<32x96xbf16>, vector<8x96xf32> -> vector<8x96xf32>
    %435 = arith.index_cast %427 : i32 to index
    %c0_111 = arith.constant 0 : index
    %436 = vector.load %arg9[%435, %c0_111] : memref<64x96xf32, #tpu.memory_space<vmem>>, vector<8x96xf32>
    %437 = vector.extract_strided_slice %436 {offsets = [0, 0], sizes = [8, 64], strides = [1, 1]} : vector<8x96xf32> to vector<8x64xf32>
    %438 = vector.extract_strided_slice %432 {offsets = [0, 0], sizes = [8, 64], strides = [1, 1]} : vector<8x96xf32> to vector<8x64xf32>
    %439 = arith.addf %437, %438 : vector<8x64xf32>
    %440 = arith.negf %439 : vector<8x64xf32>
    %441 = math.exp %440 : vector<8x64xf32>
    %cst_112 = arith.constant 1.000000e+00 : f32
    %442 = vector.broadcast %cst_112 : f32 to vector<8x64xf32>
    %443 = arith.addf %442, %441 : vector<8x64xf32>
    %444 = arith.divf %442, %443 : vector<8x64xf32>
    %445 = vector.extract_strided_slice %444 {offsets = [0, 0], sizes = [8, 32], strides = [1, 1]} : vector<8x64xf32> to vector<8x32xf32>
    %446 = vector.extract_strided_slice %444 {offsets = [0, 32], sizes = [8, 32], strides = [1, 1]} : vector<8x64xf32> to vector<8x32xf32>
    %447 = vector.extract_strided_slice %436 {offsets = [0, 64], sizes = [8, 32], strides = [1, 1]} : vector<8x96xf32> to vector<8x32xf32>
    %448 = vector.extract_strided_slice %432 {offsets = [0, 64], sizes = [8, 32], strides = [1, 1]} : vector<8x96xf32> to vector<8x32xf32>
    %449 = vector.broadcast %23 : vector<1x32xf32> to vector<8x32xf32>
    %450 = arith.addf %448, %449 : vector<8x32xf32>
    %451 = arith.mulf %445, %450 : vector<8x32xf32>
    %452 = arith.addf %447, %451 : vector<8x32xf32>
    %453 = math.tanh %452 : vector<8x32xf32>
    %454 = arith.subf %399, %453 : vector<8x32xf32>
    %455 = arith.mulf %446, %454 : vector<8x32xf32>
    %456 = arith.addf %453, %455 : vector<8x32xf32>
    %457 = arith.index_cast %430 : i32 to index
    %c0_113 = arith.constant 0 : index
    %458 = vector.load %arg10[%457, %c0_113] : memref<64x96xf32, #tpu.memory_space<vmem>>, vector<8x96xf32>
    %459 = vector.extract_strided_slice %458 {offsets = [0, 0], sizes = [8, 64], strides = [1, 1]} : vector<8x96xf32> to vector<8x64xf32>
    %460 = vector.extract_strided_slice %434 {offsets = [0, 0], sizes = [8, 64], strides = [1, 1]} : vector<8x96xf32> to vector<8x64xf32>
    %461 = arith.addf %459, %460 : vector<8x64xf32>
    %462 = arith.negf %461 : vector<8x64xf32>
    %463 = math.exp %462 : vector<8x64xf32>
    %cst_114 = arith.constant 1.000000e+00 : f32
    %464 = vector.broadcast %cst_114 : f32 to vector<8x64xf32>
    %465 = arith.addf %464, %463 : vector<8x64xf32>
    %466 = arith.divf %464, %465 : vector<8x64xf32>
    %467 = vector.extract_strided_slice %466 {offsets = [0, 0], sizes = [8, 32], strides = [1, 1]} : vector<8x64xf32> to vector<8x32xf32>
    %468 = vector.extract_strided_slice %466 {offsets = [0, 32], sizes = [8, 32], strides = [1, 1]} : vector<8x64xf32> to vector<8x32xf32>
    %469 = vector.extract_strided_slice %458 {offsets = [0, 64], sizes = [8, 32], strides = [1, 1]} : vector<8x96xf32> to vector<8x32xf32>
    %470 = vector.extract_strided_slice %434 {offsets = [0, 64], sizes = [8, 32], strides = [1, 1]} : vector<8x96xf32> to vector<8x32xf32>
    %471 = vector.broadcast %25 : vector<1x32xf32> to vector<8x32xf32>
    %472 = arith.addf %470, %471 : vector<8x32xf32>
    %473 = arith.mulf %467, %472 : vector<8x32xf32>
    %474 = arith.addf %469, %473 : vector<8x32xf32>
    %475 = math.tanh %474 : vector<8x32xf32>
    %476 = arith.subf %421, %475 : vector<8x32xf32>
    %477 = arith.mulf %468, %476 : vector<8x32xf32>
    %478 = arith.addf %475, %477 : vector<8x32xf32>
    %479 = arith.index_cast %427 : i32 to index
    %c0_115 = arith.constant 0 : index
    %480 = vector.load %arg11[%479, %c0_115] : memref<64x64xf32, #tpu.memory_space<vmem>>, vector<8x32xf32>
    tpu.vector_store %arg11[%479, %c0_115], %456 {strides = array<i32>} : memref<64x64xf32, #tpu.memory_space<vmem>>, vector<8x32xf32>,
    %481 = arith.index_cast %430 : i32 to index
    %c32_116 = arith.constant 32 : index
    %482 = vector.load %arg11[%481, %c32_116] : memref<64x64xf32, #tpu.memory_space<vmem>>, vector<8x32xf32>
    tpu.vector_store %arg11[%481, %c32_116], %478 {strides = array<i32>} : memref<64x64xf32, #tpu.memory_space<vmem>>, vector<8x32xf32>,
    %c8_i32_117 = arith.constant 8 : i32
    %c0_118 = arith.constant 0 : index
    %c0_119 = arith.constant 0 : index
    %483 = vector.load %arg11[%c0_118, %c0_119] : memref<64x64xf32, #tpu.memory_space<vmem>>, vector<64x64xf32>
    %484 = arith.truncf %483 : vector<64x64xf32> to vector<64x64xbf16>
    %c0_120 = arith.constant 0 : index
    %c0_121 = arith.constant 0 : index
    %485 = vector.load %arg6[%c0_120, %c0_121] : memref<2x64xbf16, #tpu.memory_space<vmem>>, vector<2x64xbf16>
    %cst_122 = arith.constant dense<0.000000e+00> : vector<2x64xf32>
    %486 = tpu.matmul %485, %484, %cst_122 {dimension_numbers = #tpu.dot_dimension_numbers<[1], [1], [0], [0], [0, 0, 1, 0], [], []>} : vector<2x64xbf16>, vector<64x64xbf16>, vector<2x64xf32> -> vector<2x64xf32>
    %c0_123 = arith.constant 0 : index
    %c0_124 = arith.constant 0 : index
    %487 = vector.load %arg7[%c0_123, %c0_124] : memref<2x1xf32, #tpu.memory_space<vmem>>, vector<2x1xf32>
    %488 = vector.broadcast %487 : vector<2x1xf32> to vector<2x64xf32>
    %489 = arith.addf %486, %488 : vector<2x64xf32>
    %490 = vector.extract_strided_slice %489 {offsets = [0, 0], sizes = [1, 64], strides = [1, 1]} : vector<2x64xf32> to vector<1x64xf32>
    %491 = math.exp %490 : vector<1x64xf32>
    %492 = vector.extract_strided_slice %489 {offsets = [1, 0], sizes = [1, 64], strides = [1, 1]} : vector<2x64xf32> to vector<1x64xf32>
    %cst_125 = arith.constant 0.000000e+00 : f32
    %493 = vector.broadcast %cst_125 : f32 to vector<1x64xf32>
    %494 = arith.maximumf %492, %493 : vector<1x64xf32>
    %495 = math.absf %492 : vector<1x64xf32>
    %cst_126 = arith.constant 0.000000e+00 : f32
    %496 = vector.broadcast %cst_126 : f32 to vector<1x64xf32>
    %497 = arith.subf %496, %495 : vector<1x64xf32>
    %498 = math.exp %497 : vector<1x64xf32>
    %499 = math.log1p %498 : vector<1x64xf32>
    %500 = arith.addf %494, %499 : vector<1x64xf32>
    %501 = tpu.concatenate %491, %500 in 0 : vector<1x64xf32>, vector<1x64xf32> -> vector<2x64xf32>
    %c0_127 = arith.constant 0 : index
    %c0_128 = arith.constant 0 : index
    %c0_129 = arith.constant 0 : index
    %502 = vector.load %arg8[%c0_127, %c0_128, %c0_129] : memref<1x2x64xf32, #tpu.memory_space<vmem>>, vector<1x2x64xf32>
    %503 = vector.shape_cast %502 : vector<1x2x64xf32> to vector<2x64xf32>
    %504 = vector.shape_cast %501 : vector<2x64xf32> to vector<1x2x64xf32>
    tpu.vector_store %arg8[%c0_127, %c0_128, %c0_129], %504 {strides = array<i32>} : memref<1x2x64xf32, #tpu.memory_space<vmem>>, vector<1x2x64xf32>,
    return
  }
  func.func @transform_0(%arg0: i32) -> (i32, i32, i32) {
    %c0_i32 = arith.constant 0 : i32
    %c0_i32_0 = arith.constant 0 : i32
    %c0_i32_1 = arith.constant 0 : i32
    return %arg0, %c0_i32, %c0_i32_0 : i32, i32, i32
  }
  func.func @transform_1(%arg0: i32) -> (i32, i32, i32) {
    %c0_i32 = arith.constant 0 : i32
    %c0_i32_0 = arith.constant 0 : i32
    %c0_i32_1 = arith.constant 0 : i32
    %c0_i32_2 = arith.constant 0 : i32
    return %c0_i32, %c0_i32_0, %c0_i32_1 : i32, i32, i32
  }
  func.func @transform_2(%arg0: i32) -> (i32, i32, i32) {
    %c0_i32 = arith.constant 0 : i32
    %c0_i32_0 = arith.constant 0 : i32
    %c0_i32_1 = arith.constant 0 : i32
    %c0_i32_2 = arith.constant 0 : i32
    return %c0_i32, %c0_i32_0, %c0_i32_1 : i32, i32, i32
  }
  func.func @transform_3(%arg0: i32) -> (i32, i32, i32) {
    %c0_i32 = arith.constant 0 : i32
    %c0_i32_0 = arith.constant 0 : i32
    %c0_i32_1 = arith.constant 0 : i32
    %c0_i32_2 = arith.constant 0 : i32
    return %c0_i32, %c0_i32_0, %c0_i32_1 : i32, i32, i32
  }
  func.func @transform_4(%arg0: i32) -> (i32, i32, i32) {
    %c0_i32 = arith.constant 0 : i32
    %c0_i32_0 = arith.constant 0 : i32
    %c0_i32_1 = arith.constant 0 : i32
    %c0_i32_2 = arith.constant 0 : i32
    return %c0_i32, %c0_i32_0, %c0_i32_1 : i32, i32, i32
  }
  func.func @transform_5(%arg0: i32) -> (i32, i32) {
    %c0_i32 = arith.constant 0 : i32
    %c0_i32_0 = arith.constant 0 : i32
    %c0_i32_1 = arith.constant 0 : i32
    return %c0_i32, %c0_i32_0 : i32, i32
  }
  func.func @transform_6(%arg0: i32) -> (i32, i32) {
    %c0_i32 = arith.constant 0 : i32
    %c0_i32_0 = arith.constant 0 : i32
    %c0_i32_1 = arith.constant 0 : i32
    return %c0_i32, %c0_i32_0 : i32, i32
  }
  func.func @transform_7(%arg0: i32) -> (i32, i32, i32) {
    %c0_i32 = arith.constant 0 : i32
    %c0_i32_0 = arith.constant 0 : i32
    %c0_i32_1 = arith.constant 0 : i32
    return %arg0, %c0_i32, %c0_i32_0 : i32, i32, i32
  }
}

</mosaic_0001>

<bundles_post_ra>
// kernel: squeeze.102
= control target key start
LH: loop header
LB: loop body
LE: loop exit
PB: predicated region body
PF: predicated region fallthrough
CT: control target
= control target key end

     0   :  { %s66_s8 = smov 104   ;;  %vm7_vm0 = vcmask 64512   ;;  %s67_s11 = smov 112   ;;  %s117_s0 = inlined_call_operand.vmem [shape: f32[64], index: 0, kind: input, shape index: {}]   ;;  %s118_s1 = inlined_call_operand.vmem [shape: f32[1,8,8], index: 1, kind: output, shape index: {}]  }
   0x1   :  { %v4_v0 = vld [vmem:[%s117_s0] sm:$0x1]  ;;  %s65_s0 = smov 120   ;;  %s68_s12 = smov 96  }
   0x2   :  { %5 = vst [vmem:[#allocation0] sm:$0x1] %v4_v0  ;;  %s69_s13 = smov 88   ;;  %s70_s14 = smov 80  }
   0x3   :  { %s71_s15 = smov 72  }
   0x9   :  { %v9_v1 = vld [vmem:[#allocation0] sm:$0x1]  }
   0xa   :  { %v21_v2 = vld [vmem:[#allocation0] sm:$0x1]   ;;  %10 = vrot.lane.b32.xlu0 %v9_v1, %s65_s0 }
   0xb   :  { %22 = vrot.lane.b32.xlu1 %v21_v2, %s66_s8  ;;  %v15_v3 = vld [vmem:[#allocation0] sm:$0x1]  }
   0xc   :  { %v27_v4 = vld [vmem:[#allocation0] sm:$0x1]  }
   0xd   :  { %v6_v5 = vld [vmem:[#allocation0] sm:$0x1]  }
   0xe   :  { %8 = vst.msk [vmem:[%s118_s1] sm:$0x1] %vm7_vm0, %v6_v5   ;;  %16 = vrot.lane.b32.xlu0 %v15_v3, %s67_s11  ;;  %v33_v6 = vld [vmem:[#allocation0] sm:$0x1]  }
   0xf   :  { %28 = vrot.lane.b32.xlu1 %v27_v4, %s68_s12  ;;  %v39_v7 = vld [vmem:[#allocation0] sm:$0x1]  }
  0x10   :  { %v45_v8 = vld [vmem:[#allocation0] sm:$0x1]  }
  0x12   :  { %34 = vrot.lane.b32.xlu0 %v33_v6, %s69_s13 }
  0x13   :  { %40 = vrot.lane.b32.xlu1 %v39_v7, %s70_s14 }
  0x16   :  { %46 = vrot.lane.b32.xlu0 %v45_v8, %s71_s15 }
  0x7c   :  { %v11_v9 = vpop.permute.xlu0 %10  }
  0x7d   :  { %v23_v10 = vpop.permute.xlu1 %22   ;;  %51 = vst.msk [vmem:[%s118_s1 + $0x1] sm:$0x1] %vm7_vm0, %v11_v9  }
  0x7e   :  { %53 = vst.msk [vmem:[%s118_s1 + $0x3] sm:$0x1] %vm7_vm0, %v23_v10  }
  0x80   :  { %v17_v11 = vpop.permute.xlu0 %16  }
  0x81   :  { %v29_v12 = vpop.permute.xlu1 %28   ;;  %52 = vst.msk [vmem:[%s118_s1 + $0x2] sm:$0x1] %vm7_vm0, %v17_v11  }
  0x82   :  { %54 = vst.msk [vmem:[%s118_s1 + $0x4] sm:$0x1] %vm7_vm0, %v29_v12  }
  0x84   :  { %v35_v13 = vpop.permute.xlu0 %34  }
  0x85   :  { %v41_v14 = vpop.permute.xlu1 %40   ;;  %55 = vst.msk [vmem:[%s118_s1 + $0x5] sm:$0x1] %vm7_vm0, %v35_v13  }
  0x86   :  { %56 = vst.msk [vmem:[%s118_s1 + $0x6] sm:$0x1] %vm7_vm0, %v41_v14  }
  0x88   :  { %v47_v15 = vpop.permute.xlu0 %46  }
  0x89   :  { %57 = vst.msk [vmem:[%s118_s1 + $0x7] sm:$0x1] %vm7_vm0, %v47_v15  }

// kernel: deepfactor_forward.1
= control target key start
LH: loop header
LB: loop body
LE: loop exit
PB: predicated region body
PF: predicated region fallthrough
CT: control target
= control target key end

     0   :  { %vm76_vm0 = vcmask 1041408   ;;  %vm77_vm1 = vcmask 1042432   ;;  %vm63_vm2 = vcmask 39936   ;;  %v2136_v1 = vmov 65535   ;;  %s2140_s16 = smov 64   ;;  %s2142_s27 = smov 32   ;;  %s2607_s1 = inlined_call_operand.vmem [shape: bf16[2,5,96], index: 1, kind: input, shape index: {}]   ;;  %s2608_s0 = inlined_call_operand.vmem [shape: bf16[1,64,5], index: 0, kind: input, shape index: {}]   ;;  %s2609_s3 = inlined_call_operand.vmem [shape: bf16[2,32,96], index: 3, kind: input, shape index: {}]   ;;  %s2610_s4 = inlined_call_operand.vmem [shape: f32[2,1,32], index: 4, kind: input, shape index: {}]   ;;  %s2611_s2 = inlined_call_operand.vmem [shape: f32[2,1,96], index: 2, kind: input, shape index: {}]   ;;  %s2612_s6 = inlined_call_operand.vmem [shape: f32[2,1], index: 6, kind: input, shape index: {}]   ;;  %s2613_s5 = inlined_call_operand.vmem [shape: bf16[2,64], index: 5, kind: input, shape index: {}]   ;;  %s2614_s7 = inlined_call_operand.vmem [shape: f32[1,2,64], index: 7, kind: output, shape index: {}]  }
   0x1   :  { %v35_v0 = vld [vmem:[%s2607_s1] sm:$0x7]  ;;  %v78_v2 = vsel %vm76_vm0, 4294967295, %v2136_v1  ;;  %v1744_v3 = vld [vmem:[%s2607_s1 + $0x4] sm:$0x7]  ;;  %v2137_v9 = vmov 0.0  }
   0x2   :  { %v2024_v4 = vld [vmem:[%s2608_s0] sm:$0xff]   ;;  %v79_v5 = vsel %vm77_vm1, %v78_v2, 0  ;;  %1876 = vmatprep.subr.bf16.mxu0 %v2137_v9  ;;  %v2025_v10 = vld [vmem:[%s2608_s0 + $0x8] sm:$0xff]   ;;  %v2027_v11 = vld [vmem:[%s2608_s0 + $0x10] sm:$0xff]   ;;  %vm2138_vm3 = vmmov 0   ;;  %v2139_v13 = vmov 0  }
   0x3   :  { %v81_v6 = vand.u32 %v79_v5, %v35_v0  ;;  %v168_v7 = vand.u32 %v1744_v3, %v79_v5  ;;  %1858 = vmatprep.mubr.msk.bf16.mxu1 %vm63_vm2, %v2024_v4  ;;  %v2196_v8 = vld [vmem:[%s2609_s3] sm:$0xff]   ;;  %v2210_v12 = vld [vmem:[%s2609_s3 + $0x8] sm:$0xff]   ;;  %1880 = vmatprep.mubr.msk.bf16.mxu0 %vm2138_vm3, %v2137_v9  ;;  %v2028_v16 = vld [vmem:[%s2608_s0 + $0x18] sm:$0xff]   ;;  %vm148_vm4 = vcmask 785408   ;;  %vm267_vm5 = vcmask 261120  }
   0x4   :  { %1877 = vmatpush3.bf16.msra.mxu0 %v2196_v8  ;;  %2023 = vset.pattern.permute.xlu0 %v2139_v13  ;;  %v1763_v14 = vld [vmem:[%s2610_s4 + $0x1] ss:$0 sm:$0xff]  ;;  %v1761_v15 = vld [vmem:[%s2610_s4] ss:$0 sm:$0xff]  ;;  %v2241_v17 = vld [vmem:[%s2609_s3 + $0x10] sm:$0xff]   ;;  %vm452_vm6 = vcmask 523520  }
   0x5   :  { %1856 = vmatprep.subr.bf16.mxu1 %v81_v6  ;;  %1878 = vmatprep.subr.bf16.mxu0 %v2137_v9  ;;  %v2249_v18 = vld [vmem:[%s2609_s3 + $0x18] sm:$0xff]   ;;  %v1735_v19 = vld [vmem:[%s2611_s2] ss:$0 sm:$0xff]  ;;  %v1746_v40 = vld [vmem:[%s2611_s2 + $0x1] ss:$0 sm:$0xff]  ;;  %s2141_s2 = smov 96  }
   0x6   :  { %1857 = vmatpush3.bf16.msra.mxu1 %v81_v6  ;;  %416 = vrot.lane.b32.xlu0 %v1763_v14, %s2140_s16  ;;  %vm1654_vm7 = vcmask 523264   ;;  %vm1727_vm9 = vcmask 1040384   ;;  %vm1729_vm10 = vcmask 517120  }
   0x7   :  { %1866 = vmatprep.subr.bf16.mxu1 %v168_v7 }
   0x8   :  { %1879 = vmatpush3.bf16.msra.mxu0 %v2210_v12 }
   0x9   :  { %1859 = vmatmul.mubr.msk.bf16.vlgmr.msra.gmra.mrb[0].mxu1 %vm63_vm2, %v2025_v10  ;;  %1892 = vmatprep.subr.bf16.mxu0 %v2137_v9 }
   0xa   :  { %1867 = vmatpush3.bf16.msra.mxu1 %v168_v7  ;;  %1862 = vmatprep.mubr.msk.bf16.mxu1 %vm63_vm2, %v2027_v11 }
   0xb   :  { %1884 = vmatprep.subr.bf16.mxu1 %v2137_v9  ;;  %1881 = vmatmul.mubr.bf16.vlgmr.msra.gmra.mrb[0].mxu0 %v2139_v13 }
   0xc   :  { %1893 = vmatpush3.bf16.msra.mxu0 %v2196_v8  ;;  %1896 = vmatprep.mubr.msk.bf16.mxu0 %vm2138_vm3, %v2137_v9 }
   0xd   :  { %1894 = vmatprep.subr.bf16.mxu0 %v2137_v9  ;;  %376 = vrot.lane.b32.xlu0 %v1761_v15, %s2140_s16 }
  0x10   :  { %1895 = vmatpush3.bf16.msra.mxu0 %v2210_v12 }
  0x11   :  { %1863 = vmatmul.mubr.msk.bf16.gmra.mrb[4].mxu1 %vm63_vm2, %v2028_v16  ;;  %1908 = vmatprep.subr.bf16.mxu0 %v2137_v9 }
  0x12   :  { %1868 = vmatprep.mubr.msk.bf16.mxu1 %vm63_vm2, %v2024_v4 }
  0x19   :  { %1869 = vmatmul.mubr.msk.bf16.vlgmr.msra.gmra.mrb[8].mxu1 %vm63_vm2, %v2025_v10 }
  0x1a   :  { %1885 = vmatpush3.bf16.msra.mxu1 %v2241_v17  ;;  %1872 = vmatprep.mubr.msk.bf16.mxu1 %vm63_vm2, %v2027_v11 }
  0x1b   :  { %1886 = vmatprep.subr.bf16.mxu1 %v2137_v9 }
  0x1e   :  { %1887 = vmatpush3.bf16.msra.mxu1 %v2249_v18 }
  0x1f   :  { %1900 = vmatprep.subr.bf16.mxu1 %v2137_v9 }
  0x21   :  { %1873 = vmatmul.mubr.msk.bf16.gmra.mrb[12].mxu1 %vm63_vm2, %v2028_v16 }
  0x22   :  { %1888 = vmatprep.mubr.msk.bf16.mxu1 %vm2138_vm3, %v2137_v9 }
  0x29   :  { %1889 = vmatmul.mubr.bf16.vlgmr.msra.gmra.mrb[16].mxu1 %v2139_v13 }
  0x2a   :  { %1901 = vmatpush3.bf16.msra.mxu1 %v2241_v17  ;;  %1904 = vmatprep.mubr.msk.bf16.mxu1 %vm2138_vm3, %v2137_v9 }
  0x2b   :  { %1902 = vmatprep.subr.bf16.mxu1 %v2137_v9 }
  0x2e   :  { %1903 = vmatpush3.bf16.msra.mxu1 %v2249_v18 }
  0x2f   :  { %1916 = vmatprep.subr.bf16.mxu1 %v2137_v9 }
  0x78   :  { %v2281_v54 = vpop.permute.xlu0 %416 }
  0x7f   :  { %v2287_v59 = vpop.permute.xlu0 %376 }
  0xdc   :  { %v1860_v20 = vpop.f32.mrb[0].mxu1 }
  0xdd   :  { %v126_v21 = vadd.f32 %v1860_v20, %v1735_v19  ;;  %v117_v22 = vpop.f32.mrb[1].mxu1 }
  0xde   :  { %v118_v23 = vadd.f32 %v1735_v19, %v117_v22  ;;  %v1861_v24 = vpop.f32.mrb[2].mxu1  ;;  %v305_v27 = vpop.f32.mrb[0].mxu0 }
  0xdf   :  { %151 = vst.msk [vmem:[#allocation2 + $0x10] sm:$0xff] %vm148_vm4, %v126_v21  ;;  %v129_v25 = vadd.f32 %v1861_v24, %v1735_v19  ;;  %v120_v26 = vpop.f32.mrb[3].mxu1  ;;  %v1882_v29 = vpop.f32.mrb[1].mxu0  ;;  %v379_v0 = vadd.f32 %v2287_v59, %v305_v27 }
  0xe0   :  { %149 = vst.msk [vmem:[#allocation2] sm:$0xff] %vm148_vm4, %v118_v23  ;;  %v121_v28 = vadd.f32 %v1735_v19, %v120_v26  ;;  %v308_v30 = vpop.f32.mrb[2].mxu0 }
  0xe1   :  { %152 = vst.msk [vmem:[#allocation2 + $0x18] sm:$0xff] %vm148_vm4, %v129_v25  ;;  %v1883_v31 = vpop.f32.mrb[3].mxu0 }
  0xe2   :  { %150 = vst.msk [vmem:[#allocation2 + $0x8] sm:$0xff] %vm148_vm4, %v121_v28 }
  0xe4   :  { %v1864_v32 = vpop.f32.mrb[4].mxu1 }
  0xe5   :  { %v142_v33 = vadd.f32 %v1864_v32, %v1735_v19  ;;  %v133_v34 = vpop.f32.mrb[5].mxu1 }
  0xe6   :  { %v134_v35 = vadd.f32 %v1735_v19, %v133_v34  ;;  %v1865_v36 = vpop.f32.mrb[6].mxu1 }
  0xe7   :  { %155 = vst.msk [vmem:[#allocation2 + $0x30] sm:$0xff] %vm148_vm4, %v142_v33  ;;  %v145_v37 = vadd.f32 %v1865_v36, %v1735_v19  ;;  %v136_v38 = vpop.f32.mrb[7].mxu1  ;;  %v363_v3 = vld [vmem:[#allocation2] sm:$0xff] }
  0xe8   :  { %153 = vst.msk [vmem:[#allocation2 + $0x20] sm:$0xff] %vm148_vm4, %v134_v35  ;;  %v137_v39 = vadd.f32 %v1735_v19, %v136_v38  ;;  %v364_v4 = vadd.f32 %v363_v3, %v305_v27 }
  0xe9   :  { %156 = vst.msk [vmem:[#allocation2 + $0x38] sm:$0xff] %vm148_vm4, %v145_v37 }
  0xea   :  { %154 = vst.msk [vmem:[#allocation2 + $0x28] sm:$0xff] %vm148_vm4, %v137_v39  ;;  %v1760_v6 = vmul.f32 -1.442695, %v364_v4 }
  0xec   :  { %v1870_v41 = vpop.f32.mrb[8].mxu1 }
  0xed   :  { %v213_v42 = vadd.f32 %v1870_v41, %v1746_v40  ;;  %v204_v43 = vpop.f32.mrb[9].mxu1 }
  0xee   :  { %v205_v44 = vadd.f32 %v1746_v40, %v204_v43  ;;  %v1871_v45 = vpop.f32.mrb[10].mxu1 }
  0xef   :  { %237 = vst.msk [vmem:[#allocation3 + $0x10] sm:$0xff] %vm148_vm4, %v213_v42  ;;  %v216_v46 = vadd.f32 %v1871_v45, %v1746_v40  ;;  %v207_v47 = vpop.f32.mrb[11].mxu1 }
  0xf0   :  { %235 = vst.msk [vmem:[#allocation3] sm:$0xff] %vm148_vm4, %v205_v44  ;;  %v208_v48 = vadd.f32 %v1746_v40, %v207_v47 }
  0xf1   :  { %238 = vst.msk [vmem:[#allocation3 + $0x18] sm:$0xff] %vm148_vm4, %v216_v46 }
  0xf2   :  { %236 = vst.msk [vmem:[#allocation3 + $0x8] sm:$0xff] %vm148_vm4, %v208_v48 }
  0xf4   :  { %v1874_v49 = vpop.f32.mrb[12].mxu1 }
  0xf5   :  { %v229_v50 = vadd.f32 %v1874_v49, %v1746_v40  ;;  %v220_v51 = vpop.f32.mrb[13].mxu1 }
  0xf6   :  { %v221_v52 = vadd.f32 %v1746_v40, %v220_v51  ;;  %v1875_v53 = vpop.f32.mrb[14].mxu1 }
  0xf7   :  { %241 = vst.msk [vmem:[#allocation3 + $0x30] sm:$0xff] %vm148_vm4, %v229_v50  ;;  %v232_v55 = vadd.f32 %v1875_v53, %v1746_v40  ;;  %v223_v56 = vpop.f32.mrb[15].mxu1 }
  0xf8   :  { %239 = vst.msk [vmem:[#allocation3 + $0x20] sm:$0xff] %vm148_vm4, %v221_v52  ;;  %v224_v57 = vadd.f32 %v1746_v40, %v223_v56 }
  0xf9   :  { %242 = vst.msk [vmem:[#allocation3 + $0x38] sm:$0xff] %vm148_vm4, %v232_v55  ;;  %v549_v55 = vld [vmem:[#allocation2 + $0x8] sm:$0xff] }
  0xfa   :  { %240 = vst.msk [vmem:[#allocation3 + $0x28] sm:$0xff] %vm148_vm4, %v224_v57 }
  0xfc   :  { %v357_v58 = vpop.f32.mrb[16].mxu1 }
  0xfd   :  { %v1890_v60 = vpop.f32.mrb[17].mxu1  ;;  %v419_v61 = vadd.f32 %v2281_v54, %v357_v58 }
  0xfe   :  { %v360_v62 = vpop.f32.mrb[18].mxu1  ;;  %v581_v52 = vld [vmem:[#allocation3 + $0x30] sm:$0xff] }
  0xff   :  { %421 = vrot.lane.b32.xlu1 %v419_v61, %s2140_s16  ;;  %v1891_v63 = vpop.f32.mrb[19].mxu1 }
 0x100   :  { %v403_v1 = vld [vmem:[#allocation3 + $0x38] sm:$0xff] }
 0x101   :  { %v404_v2 = vadd.f32 %v403_v1, %v357_v58 }
 0x103   :  { %381 = vrot.lane.b32.xlu1 %v379_v0, %s2140_s16  ;;  %v1762_v5 = vmul.f32 -1.442695, %v404_v2 }
 0x105   :  { %2032 = vpow2.f32 %v1762_v5 }
 0x106   :  { %2034 = vpow2.f32 %v1760_v6 }
 0x10f   :  { %v2033_v7 = vpop.eup %2032 }
 0x110   :  { %v408_v10 = vadd.f32 1.0, %v2033_v7  ;;  %v2035_v11 = vpop.eup %2034 }
 0x111   :  { %v368_v13 = vadd.f32 1.0, %v2035_v11 }
 0x112   :  { %2036 = vrcp.f32 %v408_v10 }
 0x113   :  { %2038 = vrcp.f32 %v368_v13 }
 0x11c   :  { %v2037_v14 = vpop.eup %2036 }
 0x11d   :  { %v2039_v19 = vpop.eup %2038 }
 0x171   :  { %v422_v15 = vpop.permute.xlu1 %421 }
 0x172   :  { %v424_v16 = vmul.f32 %v2037_v14, %v422_v15 }
 0x174   :  { %426 = vrot.lane.b32.xlu0 %v424_v16, %s2140_s16 }
 0x175   :  { %v382_v20 = vpop.permute.xlu1 %381 }
 0x176   :  { %v384_v21 = vmul.f32 %v2039_v19, %v382_v20 }
 0x178   :  { %386 = vrot.lane.b32.xlu1 %v384_v21, %s2140_s16 }
 0x1e6   :  { %v427_v22 = vpop.permute.xlu0 %426 }
 0x1e7   :  { %v429_v23 = vadd.f32 %v427_v22, %v403_v1 }
 0x1e9   :  { %2040 = vtanh.f32 %v429_v23 }
 0x1ea   :  { %v387_v24 = vpop.permute.xlu1 %386 }
 0x1eb   :  { %v389_v25 = vadd.f32 %v387_v24, %v363_v3 }
 0x1ed   :  { %2042 = vtanh.f32 %v389_v25 }
 0x1f3   :  { %v2041_v26 = vpop.eup %2040 }
 0x1f4   :  { %v431_v27 = vsub.f32 0.0, %v2041_v26 }
 0x1f6   :  { %433 = vrot.lane.b32.xlu0 %v431_v27, %s2141_s2 }
 0x1f7   :  { %v2043_v28 = vpop.eup %2042 }
 0x1f8   :  { %v391_v29 = vsub.f32 0.0, %v2043_v28 }
 0x1fa   :  { %393 = vrot.lane.b32.xlu1 %v391_v29, %s2141_s2 }
 0x268   :  { %v434_v30 = vpop.permute.xlu0 %433 }
 0x269   :  { %v436_v31 = vmul.f32 %v2037_v14, %v434_v30 }
 0x26b   :  { %438 = vrot.lane.b32.xlu0 %v436_v31, %s2142_s27 }
 0x26c   :  { %v394_v32 = vpop.permute.xlu1 %393 }
 0x26d   :  { %v396_v33 = vmul.f32 %v2039_v19, %v394_v32 }
 0x26f   :  { %398 = vrot.lane.b32.xlu1 %v396_v33, %s2142_s27 }
 0x2dd   :  { %v439_v34 = vpop.permute.xlu0 %438 }
 0x2de   :  { %v2299_v35 = vadd.f32 %v2041_v26, %v439_v34 }
 0x2e0   :  { %v501_v36 = vpack.c.bf16 %v2299_v35, %v2299_v35 }
 0x2e1   :  { %v399_v37 = vpop.permute.xlu1 %398 }
 0x2e2   :  { %v2303_v38 = vadd.f32 %v2043_v28, %v399_v37  ;;  %503 = vrot.lane.b32.xlu0 %v501_v36, %s2140_s16 }
 0x2e4   :  { %v454_v39 = vpack.c.bf16 %v2303_v38, %v2303_v38 }
 0x2e6   :  { %456 = vrot.lane.b32.xlu1 %v454_v39, %s2140_s16 }
 0x354   :  { %v504_v40 = vpop.permute.xlu0 %503 }
 0x355   :  { %1905 = vmatmul.mubr.msk.bf16.vlgmr.msra.gmra.mrb[20].mxu1 %vm267_vm5, %v504_v40 }
 0x356   :  { %1917 = vmatpush3.bf16.msra.mxu1 %v2241_v17  ;;  %1920 = vmatprep.mubr.msk.bf16.mxu1 %vm2138_vm3, %v2137_v9 }
 0x357   :  { %1918 = vmatprep.subr.bf16.mxu1 %v2137_v9 }
 0x358   :  { %v457_v41 = vpop.permute.xlu1 %456 }
 0x359   :  { %1897 = vmatmul.mubr.msk.bf16.vlgmr.msra.gmra.mrb[4].mxu0 %vm267_vm5, %v457_v41 }
 0x35a   :  { %1909 = vmatpush3.bf16.msra.mxu0 %v2196_v8  ;;  %1919 = vmatpush3.bf16.msra.mxu1 %v2249_v18 }
 0x35b   :  { %1910 = vmatprep.subr.bf16.mxu0 %v2137_v9  ;;  %1912 = vmatprep.mubr.msk.bf16.mxu0 %vm2138_vm3, %v2137_v9 }
 0x35c   :  { %1932 = vmatprep.subr.bf16.mxu1 %v2137_v9 }
 0x35e   :  { %1911 = vmatpush3.bf16.msra.mxu0 %v2210_v12 }
 0x35f   :  { %1924 = vmatprep.subr.bf16.mxu0 %v2137_v9 }
 0x428   :  { %v542_v42 = vpop.f32.mrb[20].mxu1 }
 0x429   :  { %v589_v43 = vadd.f32 %v542_v42, %v2281_v54  ;;  %v1906_v44 = vpop.f32.mrb[21].mxu1  ;;  %v582_v53 = vadd.f32 %v581_v52, %v542_v42 }
 0x42a   :  { %v545_v45 = vpop.f32.mrb[22].mxu1 }
 0x42b   :  { %591 = vrot.lane.b32.xlu0 %v589_v43, %s2140_s16  ;;  %v1907_v46 = vpop.f32.mrb[23].mxu1  ;;  %v1767_v56 = vmul.f32 -1.442695, %v582_v53  ;;  %v751_v43 = vld [vmem:[#allocation3 + $0x28] sm:$0xff]  ;;  %v719_v45 = vld [vmem:[#allocation2 + $0x10] sm:$0xff] }
 0x42c   :  { %v495_v47 = vpop.f32.mrb[4].mxu0 }
 0x42d   :  { %v557_v48 = vadd.f32 %v495_v47, %v2287_v59  ;;  %v1898_v49 = vpop.f32.mrb[5].mxu0  ;;  %v550_v57 = vadd.f32 %v549_v55, %v495_v47  ;;  %2044 = vpow2.f32 %v1767_v56 }
 0x42e   :  { %v498_v50 = vpop.f32.mrb[6].mxu0 }
 0x42f   :  { %559 = vrot.lane.b32.xlu1 %v557_v48, %s2140_s16  ;;  %v1899_v51 = vpop.f32.mrb[7].mxu0  ;;  %v1766_v58 = vmul.f32 -1.442695, %v550_v57 }
 0x431   :  { %2046 = vpow2.f32 %v1766_v58 }
 0x437   :  { %v2045_v60 = vpop.eup %2044 }
 0x438   :  { %v586_v61 = vadd.f32 1.0, %v2045_v60 }
 0x43a   :  { %2048 = vrcp.f32 %v586_v61 }
 0x43b   :  { %v2047_v62 = vpop.eup %2046 }
 0x43c   :  { %v554_v63 = vadd.f32 1.0, %v2047_v62 }
 0x43e   :  { %2050 = vrcp.f32 %v554_v63 }
 0x444   :  { %v2049_v0 = vpop.eup %2048 }
 0x448   :  { %v2051_v3 = vpop.eup %2050 }
 0x49d   :  { %v592_v1 = vpop.permute.xlu0 %591 }
 0x49e   :  { %v594_v2 = vmul.f32 %v2049_v0, %v592_v1 }
 0x4a0   :  { %596 = vrot.lane.b32.xlu0 %v594_v2, %s2140_s16 }
 0x4a1   :  { %v560_v4 = vpop.permute.xlu1 %559 }
 0x4a2   :  { %v562_v5 = vmul.f32 %v2051_v3, %v560_v4 }
 0x4a4   :  { %564 = vrot.lane.b32.xlu1 %v562_v5, %s2140_s16 }
 0x512   :  { %v597_v6 = vpop.permute.xlu0 %596 }
 0x513   :  { %v599_v7 = vadd.f32 %v597_v6, %v581_v52 }
 0x515   :  { %2052 = vtanh.f32 %v599_v7 }
 0x516   :  { %v565_v10 = vpop.permute.xlu1 %564 }
 0x517   :  { %v567_v11 = vadd.f32 %v565_v10, %v549_v55 }
 0x519   :  { %2054 = vtanh.f32 %v567_v11 }
 0x51f   :  { %v2053_v13 = vpop.eup %2052 }
 0x520   :  { %v601_v14 = vsub.f32 %v2299_v35, %v2053_v13 }
 0x522   :  { %603 = vrot.lane.b32.xlu0 %v601_v14, %s2141_s2 }
 0x523   :  { %v2055_v15 = vpop.eup %2054 }
 0x524   :  { %v569_v16 = vsub.f32 %v2303_v38, %v2055_v15 }
 0x526   :  { %571 = vrot.lane.b32.xlu1 %v569_v16, %s2141_s2 }
 0x594   :  { %v604_v19 = vpop.permute.xlu0 %603 }
 0x595   :  { %v606_v20 = vmul.f32 %v2049_v0, %v604_v19 }
 0x597   :  { %608 = vrot.lane.b32.xlu0 %v606_v20, %s2142_s27 }
 0x598   :  { %v572_v21 = vpop.permute.xlu1 %571 }
 0x599   :  { %v574_v22 = vmul.f32 %v2051_v3, %v572_v21 }
 0x59b   :  { %576 = vrot.lane.b32.xlu1 %v574_v22, %s2142_s27 }
 0x609   :  { %v609_v23 = vpop.permute.xlu0 %608 }
 0x60a   :  { %v2335_v24 = vadd.f32 %v2053_v13, %v609_v23 }
 0x60c   :  { %v671_v25 = vpack.c.bf16 %v2335_v24, %v2335_v24 }
 0x60d   :  { %v577_v26 = vpop.permute.xlu1 %576 }
 0x60e   :  { %v2339_v27 = vadd.f32 %v2055_v15, %v577_v26  ;;  %673 = vrot.lane.b32.xlu0 %v671_v25, %s2140_s16 }
 0x610   :  { %v624_v28 = vpack.c.bf16 %v2339_v27, %v2339_v27 }
 0x612   :  { %626 = vrot.lane.b32.xlu1 %v624_v28, %s2140_s16 }
 0x680   :  { %v674_v29 = vpop.permute.xlu0 %673 }
 0x681   :  { %1921 = vmatmul.mubr.msk.bf16.vlgmr.msra.gmra.mrb[24].mxu1 %vm267_vm5, %v674_v29 }
 0x682   :  { %1933 = vmatpush3.bf16.msra.mxu1 %v2241_v17  ;;  %1936 = vmatprep.mubr.msk.bf16.mxu1 %vm2138_vm3, %v2137_v9 }
 0x683   :  { %1934 = vmatprep.subr.bf16.mxu1 %v2137_v9 }
 0x684   :  { %v627_v30 = vpop.permute.xlu1 %626 }
 0x685   :  { %1913 = vmatmul.mubr.msk.bf16.vlgmr.msra.gmra.mrb[8].mxu0 %vm267_vm5, %v627_v30 }
 0x686   :  { %1925 = vmatpush3.bf16.msra.mxu0 %v2196_v8  ;;  %1935 = vmatpush3.bf16.msra.mxu1 %v2249_v18 }
 0x687   :  { %1926 = vmatprep.subr.bf16.mxu0 %v2137_v9  ;;  %1928 = vmatprep.mubr.msk.bf16.mxu0 %vm2138_vm3, %v2137_v9 }
 0x688   :  { %1948 = vmatprep.subr.bf16.mxu1 %v2137_v9 }
 0x68a   :  { %1927 = vmatpush3.bf16.msra.mxu0 %v2210_v12 }
 0x68b   :  { %1940 = vmatprep.subr.bf16.mxu0 %v2137_v9 }
 0x754   :  { %v712_v31 = vpop.f32.mrb[24].mxu1 }
 0x755   :  { %v759_v32 = vadd.f32 %v712_v31, %v2281_v54  ;;  %v1922_v33 = vpop.f32.mrb[25].mxu1  ;;  %v752_v44 = vadd.f32 %v751_v43, %v712_v31 }
 0x756   :  { %v715_v34 = vpop.f32.mrb[26].mxu1 }
 0x757   :  { %761 = vrot.lane.b32.xlu0 %v759_v32, %s2140_s16  ;;  %v1923_v36 = vpop.f32.mrb[27].mxu1  ;;  %v1771_v46 = vmul.f32 -1.442695, %v752_v44  ;;  %v921_v34 = vld [vmem:[#allocation3 + $0x20] sm:$0xff] }
 0x758   :  { %v665_v37 = vpop.f32.mrb[8].mxu0 }
 0x759   :  { %v727_v39 = vadd.f32 %v665_v37, %v2287_v59  ;;  %v1914_v40 = vpop.f32.mrb[9].mxu0  ;;  %v720_v47 = vadd.f32 %v719_v45, %v665_v37  ;;  %2056 = vpow2.f32 %v1771_v46  ;;  %v889_v37 = vld [vmem:[#allocation2 + $0x18] sm:$0xff] }
 0x75a   :  { %v668_v41 = vpop.f32.mrb[10].mxu0 }
 0x75b   :  { %729 = vrot.lane.b32.xlu1 %v727_v39, %s2140_s16  ;;  %v1915_v42 = vpop.f32.mrb[11].mxu0  ;;  %v1770_v48 = vmul.f32 -1.442695, %v720_v47 }
 0x75d   :  { %2058 = vpow2.f32 %v1770_v48 }
 0x763   :  { %v2057_v49 = vpop.eup %2056 }
 0x764   :  { %v756_v50 = vadd.f32 1.0, %v2057_v49 }
 0x766   :  { %2060 = vrcp.f32 %v756_v50 }
 0x767   :  { %v2059_v51 = vpop.eup %2058 }
 0x768   :  { %v724_v52 = vadd.f32 1.0, %v2059_v51 }
 0x76a   :  { %2062 = vrcp.f32 %v724_v52 }
 0x770   :  { %v2061_v53 = vpop.eup %2060 }
 0x774   :  { %v2063_v57 = vpop.eup %2062 }
 0x7c9   :  { %v762_v55 = vpop.permute.xlu0 %761 }
 0x7ca   :  { %v764_v56 = vmul.f32 %v2061_v53, %v762_v55 }
 0x7cc   :  { %766 = vrot.lane.b32.xlu0 %v764_v56, %s2140_s16 }
 0x7cd   :  { %v730_v58 = vpop.permute.xlu1 %729 }
 0x7ce   :  { %v732_v60 = vmul.f32 %v2063_v57, %v730_v58 }
 0x7d0   :  { %734 = vrot.lane.b32.xlu1 %v732_v60, %s2140_s16 }
 0x83e   :  { %v767_v61 = vpop.permute.xlu0 %766 }
 0x83f   :  { %v769_v62 = vadd.f32 %v767_v61, %v751_v43 }
 0x841   :  { %2064 = vtanh.f32 %v769_v62 }
 0x842   :  { %v735_v63 = vpop.permute.xlu1 %734 }
 0x843   :  { %v737_v0 = vadd.f32 %v735_v63, %v719_v45 }
 0x845   :  { %2066 = vtanh.f32 %v737_v0 }
 0x84b   :  { %v2065_v1 = vpop.eup %2064 }
 0x84c   :  { %v771_v2 = vsub.f32 %v2335_v24, %v2065_v1 }
 0x84e   :  { %773 = vrot.lane.b32.xlu0 %v771_v2, %s2141_s2 }
 0x84f   :  { %v2067_v3 = vpop.eup %2066 }
 0x850   :  { %v739_v4 = vsub.f32 %v2339_v27, %v2067_v3 }
 0x852   :  { %741 = vrot.lane.b32.xlu1 %v739_v4, %s2141_s2 }
 0x8c0   :  { %v774_v5 = vpop.permute.xlu0 %773 }
 0x8c1   :  { %v776_v6 = vmul.f32 %v2061_v53, %v774_v5 }
 0x8c3   :  { %778 = vrot.lane.b32.xlu0 %v776_v6, %s2142_s27 }
 0x8c4   :  { %v742_v7 = vpop.permute.xlu1 %741 }
 0x8c5   :  { %v744_v10 = vmul.f32 %v2063_v57, %v742_v7 }
 0x8c7   :  { %746 = vrot.lane.b32.xlu1 %v744_v10, %s2142_s27 }
 0x935   :  { %v779_v11 = vpop.permute.xlu0 %778 }
 0x936   :  { %v2371_v13 = vadd.f32 %v2065_v1, %v779_v11 }
 0x938   :  { %v841_v14 = vpack.c.bf16 %v2371_v13, %v2371_v13 }
 0x939   :  { %v747_v15 = vpop.permute.xlu1 %746 }
 0x93a   :  { %v2375_v16 = vadd.f32 %v2067_v3, %v747_v15  ;;  %843 = vrot.lane.b32.xlu0 %v841_v14, %s2140_s16 }
 0x93c   :  { %v794_v19 = vpack.c.bf16 %v2375_v16, %v2375_v16 }
 0x93e   :  { %796 = vrot.lane.b32.xlu1 %v794_v19, %s2140_s16 }
 0x9ac   :  { %v844_v20 = vpop.permute.xlu0 %843 }
 0x9ad   :  { %1937 = vmatmul.mubr.msk.bf16.vlgmr.msra.gmra.mrb[28].mxu1 %vm267_vm5, %v844_v20 }
 0x9ae   :  { %1949 = vmatpush3.bf16.msra.mxu1 %v2241_v17  ;;  %1952 = vmatprep.mubr.msk.bf16.mxu1 %vm2138_vm3, %v2137_v9 }
 0x9af   :  { %1950 = vmatprep.subr.bf16.mxu1 %v2137_v9 }
 0x9b0   :  { %v797_v21 = vpop.permute.xlu1 %796 }
 0x9b1   :  { %1929 = vmatmul.mubr.msk.bf16.vlgmr.msra.gmra.mrb[12].mxu0 %vm267_vm5, %v797_v21 }
 0x9b2   :  { %1941 = vmatpush3.bf16.msra.mxu0 %v2196_v8  ;;  %1951 = vmatpush3.bf16.msra.mxu1 %v2249_v18 }
 0x9b3   :  { %1942 = vmatprep.subr.bf16.mxu0 %v2137_v9  ;;  %1944 = vmatprep.mubr.msk.bf16.mxu0 %vm2138_vm3, %v2137_v9 }
 0x9b4   :  { %1964 = vmatprep.subr.bf16.mxu1 %v2137_v9 }
 0x9b6   :  { %1943 = vmatpush3.bf16.msra.mxu0 %v2210_v12 }
 0x9b7   :  { %1956 = vmatprep.subr.bf16.mxu0 %v2137_v9 }
 0xa80   :  { %v882_v22 = vpop.f32.mrb[28].mxu1 }
 0xa81   :  { %v929_v23 = vadd.f32 %v882_v22, %v2281_v54  ;;  %v1938_v25 = vpop.f32.mrb[29].mxu1  ;;  %v922_v36 = vadd.f32 %v921_v34, %v882_v22 }
 0xa82   :  { %v885_v26 = vpop.f32.mrb[30].mxu1 }
 0xa83   :  { %931 = vrot.lane.b32.xlu0 %v929_v23, %s2140_s16  ;;  %v1939_v28 = vpop.f32.mrb[31].mxu1  ;;  %v1775_v39 = vmul.f32 -1.442695, %v922_v36 }
 0xa84   :  { %v835_v29 = vpop.f32.mrb[12].mxu0 }
 0xa85   :  { %v897_v30 = vadd.f32 %v835_v29, %v2287_v59  ;;  %v1930_v31 = vpop.f32.mrb[13].mxu0  ;;  %v890_v40 = vadd.f32 %v889_v37, %v835_v29  ;;  %2068 = vpow2.f32 %v1775_v39  ;;  %v1091_v29 = vld [vmem:[#allocation3 + $0x18] sm:$0xff] }
 0xa86   :  { %v838_v32 = vpop.f32.mrb[14].mxu0  ;;  %v1059_v31 = vld [vmem:[#allocation2 + $0x20] sm:$0xff] }
 0xa87   :  { %899 = vrot.lane.b32.xlu1 %v897_v30, %s2140_s16  ;;  %v1931_v33 = vpop.f32.mrb[15].mxu0  ;;  %v1774_v41 = vmul.f32 -1.442695, %v890_v40 }
 0xa89   :  { %2070 = vpow2.f32 %v1774_v41 }
 0xa8f   :  { %v2069_v42 = vpop.eup %2068 }
 0xa90   :  { %v926_v43 = vadd.f32 1.0, %v2069_v42 }
 0xa92   :  { %2072 = vrcp.f32 %v926_v43 }
 0xa93   :  { %v2071_v44 = vpop.eup %2070 }
 0xa94   :  { %v894_v45 = vadd.f32 1.0, %v2071_v44 }
 0xa96   :  { %2074 = vrcp.f32 %v894_v45 }
 0xa9c   :  { %v2073_v46 = vpop.eup %2072 }
 0xaa0   :  { %v2075_v49 = vpop.eup %2074 }
 0xaf5   :  { %v932_v47 = vpop.permute.xlu0 %931 }
 0xaf6   :  { %v934_v48 = vmul.f32 %v2073_v46, %v932_v47 }
 0xaf8   :  { %936 = vrot.lane.b32.xlu0 %v934_v48, %s2140_s16 }
 0xaf9   :  { %v900_v50 = vpop.permute.xlu1 %899 }
 0xafa   :  { %v902_v51 = vmul.f32 %v2075_v49, %v900_v50 }
 0xafc   :  { %904 = vrot.lane.b32.xlu1 %v902_v51, %s2140_s16 }
 0xb6a   :  { %v937_v52 = vpop.permute.xlu0 %936 }
 0xb6b   :  { %v939_v53 = vadd.f32 %v937_v52, %v921_v34 }
 0xb6d   :  { %2076 = vtanh.f32 %v939_v53 }
 0xb6e   :  { %v905_v55 = vpop.permute.xlu1 %904 }
 0xb6f   :  { %v907_v56 = vadd.f32 %v905_v55, %v889_v37 }
 0xb71   :  { %2078 = vtanh.f32 %v907_v56 }
 0xb77   :  { %v2077_v57 = vpop.eup %2076 }
 0xb78   :  { %v941_v58 = vsub.f32 %v2371_v13, %v2077_v57 }
 0xb7a   :  { %943 = vrot.lane.b32.xlu0 %v941_v58, %s2141_s2 }
 0xb7b   :  { %v2079_v60 = vpop.eup %2078 }
 0xb7c   :  { %v909_v61 = vsub.f32 %v2375_v16, %v2079_v60 }
 0xb7e   :  { %911 = vrot.lane.b32.xlu1 %v909_v61, %s2141_s2 }
 0xbec   :  { %v944_v62 = vpop.permute.xlu0 %943 }
 0xbed   :  { %v946_v63 = vmul.f32 %v2073_v46, %v944_v62 }
 0xbef   :  { %948 = vrot.lane.b32.xlu0 %v946_v63, %s2142_s27 }
 0xbf0   :  { %v912_v0 = vpop.permute.xlu1 %911 }
 0xbf1   :  { %v914_v1 = vmul.f32 %v2075_v49, %v912_v0 }
 0xbf3   :  { %916 = vrot.lane.b32.xlu1 %v914_v1, %s2142_s27 }
 0xc61   :  { %v949_v2 = vpop.permute.xlu0 %948 }
 0xc62   :  { %v2407_v3 = vadd.f32 %v2077_v57, %v949_v2 }
 0xc64   :  { %v1011_v4 = vpack.c.bf16 %v2407_v3, %v2407_v3 }
 0xc65   :  { %v917_v5 = vpop.permute.xlu1 %916 }
 0xc66   :  { %v2411_v6 = vadd.f32 %v2079_v60, %v917_v5  ;;  %1013 = vrot.lane.b32.xlu0 %v1011_v4, %s2140_s16 }
 0xc68   :  { %v964_v7 = vpack.c.bf16 %v2411_v6, %v2411_v6 }
 0xc6a   :  { %966 = vrot.lane.b32.xlu1 %v964_v7, %s2140_s16 }
 0xcd8   :  { %v1014_v10 = vpop.permute.xlu0 %1013 }
 0xcd9   :  { %1953 = vmatmul.mubr.msk.bf16.vlgmr.msra.gmra.mrb[32].mxu1 %vm267_vm5, %v1014_v10 }
 0xcda   :  { %1965 = vmatpush3.bf16.msra.mxu1 %v2241_v17  ;;  %1968 = vmatprep.mubr.msk.bf16.mxu1 %vm2138_vm3, %v2137_v9 }
 0xcdb   :  { %1966 = vmatprep.subr.bf16.mxu1 %v2137_v9 }
 0xcdc   :  { %v967_v11 = vpop.permute.xlu1 %966 }
 0xcdd   :  { %1945 = vmatmul.mubr.msk.bf16.vlgmr.msra.gmra.mrb[16].mxu0 %vm267_vm5, %v967_v11 }
 0xcde   :  { %1957 = vmatpush3.bf16.msra.mxu0 %v2196_v8  ;;  %1967 = vmatpush3.bf16.msra.mxu1 %v2249_v18 }
 0xcdf   :  { %1958 = vmatprep.subr.bf16.mxu0 %v2137_v9  ;;  %1960 = vmatprep.mubr.msk.bf16.mxu0 %vm2138_vm3, %v2137_v9 }
 0xce0   :  { %1980 = vmatprep.subr.bf16.mxu1 %v2137_v9 }
 0xce2   :  { %1959 = vmatpush3.bf16.msra.mxu0 %v2210_v12 }
 0xce3   :  { %1972 = vmatprep.subr.bf16.mxu0 %v2137_v9 }
 0xdac   :  { %v1052_v14 = vpop.f32.mrb[32].mxu1 }
 0xdad   :  { %v1099_v15 = vadd.f32 %v1052_v14, %v2281_v54  ;;  %v1954_v19 = vpop.f32.mrb[33].mxu1  ;;  %v1092_v30 = vadd.f32 %v1091_v29, %v1052_v14 }
 0xdae   :  { %v1055_v20 = vpop.f32.mrb[34].mxu1 }
 0xdaf   :  { %1101 = vrot.lane.b32.xlu0 %v1099_v15, %s2140_s16  ;;  %v1955_v21 = vpop.f32.mrb[35].mxu1  ;;  %v1779_v32 = vmul.f32 -1.442695, %v1092_v30 }
 0xdb0   :  { %v1005_v22 = vpop.f32.mrb[16].mxu0 }
 0xdb1   :  { %v1067_v23 = vadd.f32 %v1005_v22, %v2287_v59  ;;  %v1946_v25 = vpop.f32.mrb[17].mxu0  ;;  %v1060_v33 = vadd.f32 %v1059_v31, %v1005_v22  ;;  %2080 = vpow2.f32 %v1779_v32 }
 0xdb2   :  { %v1008_v26 = vpop.f32.mrb[18].mxu0  ;;  %v1227_v25 = vld [vmem:[#allocation2 + $0x28] sm:$0xff] }
 0xdb3   :  { %1069 = vrot.lane.b32.xlu1 %v1067_v23, %s2140_s16  ;;  %v1947_v28 = vpop.f32.mrb[19].mxu0  ;;  %v1778_v34 = vmul.f32 -1.442695, %v1060_v33  ;;  %v1259_v23 = vld [vmem:[#allocation3 + $0x10] sm:$0xff] }
 0xdb5   :  { %2082 = vpow2.f32 %v1778_v34 }
 0xdbb   :  { %v2081_v36 = vpop.eup %2080 }
 0xdbc   :  { %v1096_v37 = vadd.f32 1.0, %v2081_v36 }
 0xdbe   :  { %2084 = vrcp.f32 %v1096_v37 }
 0xdbf   :  { %v2083_v39 = vpop.eup %2082 }
 0xdc0   :  { %v1064_v40 = vadd.f32 1.0, %v2083_v39 }
 0xdc2   :  { %2086 = vrcp.f32 %v1064_v40 }
 0xdc8   :  { %v2085_v41 = vpop.eup %2084 }
 0xdcc   :  { %v2087_v44 = vpop.eup %2086 }
 0xe21   :  { %v1102_v42 = vpop.permute.xlu0 %1101 }
 0xe22   :  { %v1104_v43 = vmul.f32 %v2085_v41, %v1102_v42 }
 0xe24   :  { %1106 = vrot.lane.b32.xlu0 %v1104_v43, %s2140_s16 }
 0xe25   :  { %v1070_v45 = vpop.permute.xlu1 %1069 }
 0xe26   :  { %v1072_v46 = vmul.f32 %v2087_v44, %v1070_v45 }
 0xe28   :  { %1074 = vrot.lane.b32.xlu1 %v1072_v46, %s2140_s16 }
 0xe96   :  { %v1107_v47 = vpop.permute.xlu0 %1106 }
 0xe97   :  { %v1109_v48 = vadd.f32 %v1107_v47, %v1091_v29 }
 0xe99   :  { %2088 = vtanh.f32 %v1109_v48 }
 0xe9a   :  { %v1075_v49 = vpop.permute.xlu1 %1074 }
 0xe9b   :  { %v1077_v50 = vadd.f32 %v1075_v49, %v1059_v31 }
 0xe9d   :  { %2090 = vtanh.f32 %v1077_v50 }
 0xea3   :  { %v2089_v51 = vpop.eup %2088 }
 0xea4   :  { %v1111_v52 = vsub.f32 %v2407_v3, %v2089_v51 }
 0xea6   :  { %1113 = vrot.lane.b32.xlu0 %v1111_v52, %s2141_s2 }
 0xea7   :  { %v2091_v53 = vpop.eup %2090 }
 0xea8   :  { %v1079_v55 = vsub.f32 %v2411_v6, %v2091_v53 }
 0xeaa   :  { %1081 = vrot.lane.b32.xlu1 %v1079_v55, %s2141_s2 }
 0xf18   :  { %v1114_v56 = vpop.permute.xlu0 %1113 }
 0xf19   :  { %v1116_v57 = vmul.f32 %v2085_v41, %v1114_v56 }
 0xf1b   :  { %1118 = vrot.lane.b32.xlu0 %v1116_v57, %s2142_s27 }
 0xf1c   :  { %v1082_v58 = vpop.permute.xlu1 %1081 }
 0xf1d   :  { %v1084_v60 = vmul.f32 %v2087_v44, %v1082_v58 }
 0xf1f   :  { %1086 = vrot.lane.b32.xlu1 %v1084_v60, %s2142_s27 }
 0xf8d   :  { %v1119_v61 = vpop.permute.xlu0 %1118 }
 0xf8e   :  { %v2443_v62 = vadd.f32 %v2089_v51, %v1119_v61 }
 0xf90   :  { %v1179_v63 = vpack.c.bf16 %v2443_v62, %v2443_v62 }
 0xf91   :  { %v1087_v0 = vpop.permute.xlu1 %1086 }
 0xf92   :  { %v2447_v1 = vadd.f32 %v2091_v53, %v1087_v0  ;;  %1181 = vrot.lane.b32.xlu0 %v1179_v63, %s2140_s16 }
 0xf94   :  { %v1132_v2 = vpack.c.bf16 %v2447_v1, %v2447_v1 }
 0xf96   :  { %1134 = vrot.lane.b32.xlu1 %v1132_v2, %s2140_s16  ;;  %v2134_v2 = vld [vmem:[%s2609_s3] sm:$0xff]  }
0x1004   :  { %v1182_v4 = vpop.permute.xlu0 %1181 }
0x1005   :  { %1969 = vmatmul.mubr.msk.bf16.vlgmr.msra.gmra.mrb[36].mxu1 %vm267_vm5, %v1182_v4 }
0x1006   :  { %1981 = vmatpush3.bf16.msra.mxu1 %v2241_v17  ;;  %1984 = vmatprep.mubr.msk.bf16.mxu1 %vm2138_vm3, %v2137_v9 }
0x1007   :  { %1982 = vmatprep.subr.bf16.mxu1 %v2137_v9 }
0x1008   :  { %v1135_v5 = vpop.permute.xlu1 %1134 }
0x1009   :  { %1961 = vmatmul.mubr.msk.bf16.vlgmr.msra.gmra.mrb[20].mxu0 %vm267_vm5, %v1135_v5 }
0x100a   :  { %1973 = vmatpush3.bf16.msra.mxu0 %v2196_v8  ;;  %1983 = vmatpush3.bf16.msra.mxu1 %v2249_v18 }
0x100b   :  { %1974 = vmatprep.subr.bf16.mxu0 %v2137_v9  ;;  %1976 = vmatprep.mubr.msk.bf16.mxu0 %vm2138_vm3, %v2137_v9 }
0x100c   :  { %1996 = vmatprep.subr.bf16.mxu1 %v2137_v9 }
0x100e   :  { %1975 = vmatpush3.bf16.msra.mxu0 %v2210_v12 }
0x100f   :  { %1988 = vmatprep.subr.bf16.mxu0 %v2137_v9 }
0x10d8   :  { %v1220_v7 = vpop.f32.mrb[36].mxu1 }
0x10d9   :  { %v1267_v10 = vadd.f32 %v1220_v7, %v2281_v54  ;;  %v1970_v11 = vpop.f32.mrb[37].mxu1  ;;  %v1260_v12 = vadd.f32 %v1259_v23, %v1220_v7 }
0x10da   :  { %v1223_v14 = vpop.f32.mrb[38].mxu1 }
0x10db   :  { %1269 = vrot.lane.b32.xlu0 %v1267_v10, %s2140_s16  ;;  %v1971_v8 = vpop.f32.mrb[39].mxu1  ;;  %v1783_v26 = vmul.f32 -1.442695, %v1260_v12 }
0x10dc   :  { %v1173_v15 = vpop.f32.mrb[20].mxu0 }
0x10dd   :  { %v1235_v19 = vadd.f32 %v1173_v15, %v2287_v59  ;;  %v1962_v20 = vpop.f32.mrb[21].mxu0  ;;  %v1228_v28 = vadd.f32 %v1227_v25, %v1173_v15  ;;  %2092 = vpow2.f32 %v1783_v26 }
0x10de   :  { %v1176_v21 = vpop.f32.mrb[22].mxu0  ;;  %v1427_v20 = vld [vmem:[#allocation3 + $0x8] sm:$0xff] }
0x10df   :  { %1237 = vrot.lane.b32.xlu1 %v1235_v19, %s2140_s16  ;;  %v1963_v22 = vpop.f32.mrb[23].mxu0  ;;  %v1782_v29 = vmul.f32 -1.442695, %v1228_v28 }
0x10e0   :  { %v1395_v22 = vld [vmem:[#allocation2 + $0x30] sm:$0xff] }
0x10e1   :  { %2094 = vpow2.f32 %v1782_v29 }
0x10e7   :  { %v2093_v30 = vpop.eup %2092 }
0x10e8   :  { %v1264_v31 = vadd.f32 1.0, %v2093_v30 }
0x10ea   :  { %2096 = vrcp.f32 %v1264_v31 }
0x10eb   :  { %v2095_v32 = vpop.eup %2094 }
0x10ec   :  { %v1232_v33 = vadd.f32 1.0, %v2095_v32 }
0x10ee   :  { %2098 = vrcp.f32 %v1232_v33 }
0x10f4   :  { %v2097_v34 = vpop.eup %2096 }
0x10f8   :  { %v2099_v39 = vpop.eup %2098 }
0x114d   :  { %v1270_v36 = vpop.permute.xlu0 %1269 }
0x114e   :  { %v1272_v37 = vmul.f32 %v2097_v34, %v1270_v36 }
0x1150   :  { %1274 = vrot.lane.b32.xlu0 %v1272_v37, %s2140_s16 }
0x1151   :  { %v1238_v40 = vpop.permute.xlu1 %1237 }
0x1152   :  { %v1240_v41 = vmul.f32 %v2099_v39, %v1238_v40 }
0x1154   :  { %1242 = vrot.lane.b32.xlu1 %v1240_v41, %s2140_s16 }
0x11c2   :  { %v1275_v42 = vpop.permute.xlu0 %1274 }
0x11c3   :  { %v1277_v43 = vadd.f32 %v1275_v42, %v1259_v23 }
0x11c5   :  { %2100 = vtanh.f32 %v1277_v43 }
0x11c6   :  { %v1243_v44 = vpop.permute.xlu1 %1242 }
0x11c7   :  { %v1245_v45 = vadd.f32 %v1243_v44, %v1227_v25 }
0x11c9   :  { %2102 = vtanh.f32 %v1245_v45 }
0x11cf   :  { %v2101_v46 = vpop.eup %2100 }
0x11d0   :  { %v1279_v47 = vsub.f32 %v2443_v62, %v2101_v46 }
0x11d2   :  { %1281 = vrot.lane.b32.xlu0 %v1279_v47, %s2141_s2 }
0x11d3   :  { %v2103_v48 = vpop.eup %2102 }
0x11d4   :  { %v1247_v49 = vsub.f32 %v2447_v1, %v2103_v48 }
0x11d6   :  { %1249 = vrot.lane.b32.xlu1 %v1247_v49, %s2141_s2 }
0x1244   :  { %v1282_v50 = vpop.permute.xlu0 %1281 }
0x1245   :  { %v1284_v51 = vmul.f32 %v2097_v34, %v1282_v50 }
0x1247   :  { %1286 = vrot.lane.b32.xlu0 %v1284_v51, %s2142_s27 }
0x1248   :  { %v1250_v52 = vpop.permute.xlu1 %1249 }
0x1249   :  { %v1252_v53 = vmul.f32 %v2099_v39, %v1250_v52 }
0x124b   :  { %1254 = vrot.lane.b32.xlu1 %v1252_v53, %s2142_s27 }
0x12b9   :  { %v1287_v55 = vpop.permute.xlu0 %1286 }
0x12ba   :  { %v2479_v56 = vadd.f32 %v2101_v46, %v1287_v55 }
0x12bc   :  { %v1347_v57 = vpack.c.bf16 %v2479_v56, %v2479_v56 }
0x12bd   :  { %v1255_v58 = vpop.permute.xlu1 %1254 }
0x12be   :  { %v2483_v60 = vadd.f32 %v2103_v48, %v1255_v58  ;;  %1349 = vrot.lane.b32.xlu0 %v1347_v57, %s2140_s16 }
0x12c0   :  { %v1300_v61 = vpack.c.bf16 %v2483_v60, %v2483_v60 }
0x12c2   :  { %1302 = vrot.lane.b32.xlu1 %v1300_v61, %s2140_s16 }
0x1330   :  { %v1350_v63 = vpop.permute.xlu0 %1349 }
0x1331   :  { %1985 = vmatmul.mubr.msk.bf16.vlgmr.msra.gmra.mrb[40].mxu1 %vm267_vm5, %v1350_v63 }
0x1332   :  { %1997 = vmatpush3.bf16.msra.mxu1 %v2241_v17  ;;  %2000 = vmatprep.mubr.msk.bf16.mxu1 %vm2138_vm3, %v2137_v9  ;;  %v2135_v17 = vld [vmem:[%s2609_s3 + $0x8] sm:$0xff]  }
0x1333   :  { %1998 = vmatprep.subr.bf16.mxu1 %v2137_v9 }
0x1334   :  { %v1303_v0 = vpop.permute.xlu1 %1302 }
0x1335   :  { %1977 = vmatmul.mubr.msk.bf16.vlgmr.msra.gmra.mrb[24].mxu0 %vm267_vm5, %v1303_v0 }
0x1336   :  { %1989 = vmatpush3.bf16.msra.mxu0 %v2134_v2  ;;  %1999 = vmatpush3.bf16.msra.mxu1 %v2249_v18 }
0x1337   :  { %1990 = vmatprep.subr.bf16.mxu0 %v2137_v9  ;;  %1992 = vmatprep.mubr.msk.bf16.mxu0 %vm2138_vm3, %v2137_v9 }
0x133a   :  { %1991 = vmatpush3.bf16.msra.mxu0 %v2135_v17 }
0x133b   :  { %2004 = vmatprep.subr.bf16.mxu0 %v2137_v9 }
0x1404   :  { %v1388_v4 = vpop.f32.mrb[40].mxu1 }
0x1405   :  { %v1435_v5 = vadd.f32 %v1388_v4, %v2281_v54  ;;  %v1986_v7 = vpop.f32.mrb[41].mxu1  ;;  %v1428_v21 = vadd.f32 %v1427_v20, %v1388_v4 }
0x1406   :  { %v1391_v10 = vpop.f32.mrb[42].mxu1 }
0x1407   :  { %1437 = vrot.lane.b32.xlu0 %v1435_v5, %s2140_s16  ;;  %v1987_v18 = vpop.f32.mrb[43].mxu1  ;;  %v1787_v23 = vmul.f32 -1.442695, %v1428_v21 }
0x1408   :  { %v1341_v11 = vpop.f32.mrb[24].mxu0 }
0x1409   :  { %v1403_v14 = vadd.f32 %v1341_v11, %v2287_v59  ;;  %v1978_v8 = vpop.f32.mrb[25].mxu0  ;;  %v1396_v12 = vadd.f32 %v1395_v22, %v1341_v11  ;;  %2104 = vpow2.f32 %v1787_v23 }
0x140a   :  { %v1344_v15 = vpop.f32.mrb[26].mxu0  ;;  %v1594_v8 = vld [vmem:[#allocation3] sm:$0xff] }
0x140b   :  { %1405 = vrot.lane.b32.xlu1 %v1403_v14, %s2140_s16  ;;  %v1979_v19 = vpop.f32.mrb[27].mxu0  ;;  %v1786_v25 = vmul.f32 -1.442695, %v1396_v12 }
0x140c   :  { %v1563_v19 = vld [vmem:[#allocation2 + $0x38] sm:$0xff] }
0x140d   :  { %2106 = vpow2.f32 %v1786_v25 }
0x1413   :  { %v2105_v26 = vpop.eup %2104 }
0x1414   :  { %v1432_v28 = vadd.f32 1.0, %v2105_v26 }
0x1416   :  { %2108 = vrcp.f32 %v1432_v28 }
0x1417   :  { %v2107_v29 = vpop.eup %2106 }
0x1418   :  { %v1400_v30 = vadd.f32 1.0, %v2107_v29 }
0x141a   :  { %2110 = vrcp.f32 %v1400_v30 }
0x1420   :  { %v2109_v31 = vpop.eup %2108 }
0x1424   :  { %v2111_v34 = vpop.eup %2110 }
0x1479   :  { %v1438_v32 = vpop.permute.xlu0 %1437 }
0x147a   :  { %v1440_v33 = vmul.f32 %v2109_v31, %v1438_v32 }
0x147c   :  { %1442 = vrot.lane.b32.xlu0 %v1440_v33, %s2140_s16 }
0x147d   :  { %v1406_v36 = vpop.permute.xlu1 %1405 }
0x147e   :  { %v1408_v37 = vmul.f32 %v2111_v34, %v1406_v36 }
0x1480   :  { %1410 = vrot.lane.b32.xlu1 %v1408_v37, %s2140_s16 }
0x14ee   :  { %v1443_v39 = vpop.permute.xlu0 %1442 }
0x14ef   :  { %v1445_v40 = vadd.f32 %v1443_v39, %v1427_v20 }
0x14f1   :  { %2112 = vtanh.f32 %v1445_v40 }
0x14f2   :  { %v1411_v41 = vpop.permute.xlu1 %1410 }
0x14f3   :  { %v1413_v42 = vadd.f32 %v1411_v41, %v1395_v22 }
0x14f5   :  { %2114 = vtanh.f32 %v1413_v42 }
0x14fb   :  { %v2113_v43 = vpop.eup %2112 }
0x14fc   :  { %v1447_v44 = vsub.f32 %v2479_v56, %v2113_v43 }
0x14fe   :  { %1449 = vrot.lane.b32.xlu0 %v1447_v44, %s2141_s2 }
0x14ff   :  { %v2115_v45 = vpop.eup %2114 }
0x1500   :  { %v1415_v46 = vsub.f32 %v2483_v60, %v2115_v45 }
0x1502   :  { %1417 = vrot.lane.b32.xlu1 %v1415_v46, %s2141_s2 }
0x1570   :  { %v1450_v47 = vpop.permute.xlu0 %1449 }
0x1571   :  { %v1452_v48 = vmul.f32 %v2109_v31, %v1450_v47 }
0x1573   :  { %1454 = vrot.lane.b32.xlu0 %v1452_v48, %s2142_s27 }
0x1574   :  { %v1418_v49 = vpop.permute.xlu1 %1417 }
0x1575   :  { %v1420_v50 = vmul.f32 %v2111_v34, %v1418_v49 }
0x1577   :  { %1422 = vrot.lane.b32.xlu1 %v1420_v50, %s2142_s27 }
0x15e5   :  { %v1455_v51 = vpop.permute.xlu0 %1454 }
0x15e6   :  { %v2518_v52 = vadd.f32 %v2113_v43, %v1455_v51 }
0x15e8   :  { %v1515_v53 = vpack.c.bf16 %v2518_v52, %v2518_v52 }
0x15e9   :  { %v1423_v55 = vpop.permute.xlu1 %1422 }
0x15ea   :  { %v2522_v57 = vadd.f32 %v2115_v45, %v1423_v55  ;;  %1517 = vrot.lane.b32.xlu0 %v1515_v53, %s2140_s16 }
0x15ec   :  { %v1468_v58 = vpack.c.bf16 %v2522_v57, %v2522_v57 }
0x15ee   :  { %1470 = vrot.lane.b32.xlu1 %v1468_v58, %s2140_s16 }
0x165c   :  { %v1518_v61 = vpop.permute.xlu0 %1517 }
0x165d   :  { %2001 = vmatmul.mubr.msk.bf16.vlgmr.msra.gmra.mrb[44].mxu1 %vm267_vm5, %v1518_v61 }
0x1660   :  { %v1471_v63 = vpop.permute.xlu1 %1470 }
0x1661   :  { %1993 = vmatmul.mubr.msk.bf16.vlgmr.msra.gmra.mrb[28].mxu0 %vm267_vm5, %v1471_v63 }
0x1662   :  { %2012 = vmatprep.mubr.msk.bf16.mxu0 %vm2138_vm3, %v2137_v9 }
0x1730   :  { %v1556_v0 = vpop.f32.mrb[44].mxu1 }
0x1731   :  { %v1602_v2 = vadd.f32 %v1556_v0, %v2281_v54  ;;  %v2002_v17 = vpop.f32.mrb[45].mxu1  ;;  %v1595_v15 = vadd.f32 %v1594_v8, %v1556_v0 }
0x1732   :  { %v1559_v4 = vpop.f32.mrb[46].mxu1 }
0x1733   :  { %1604 = vrot.lane.b32.xlu0 %v1602_v2, %s2140_s16  ;;  %v2003_v5 = vpop.f32.mrb[47].mxu1  ;;  %v1791_v20 = vmul.f32 -1.442695, %v1595_v15 }
0x1734   :  { %v1509_v7 = vpop.f32.mrb[28].mxu0 }
0x1735   :  { %v1571_v10 = vadd.f32 %v1509_v7, %v2287_v59  ;;  %v1994_v18 = vpop.f32.mrb[29].mxu0  ;;  %v1564_v21 = vadd.f32 %v1563_v19, %v1509_v7  ;;  %2116 = vpow2.f32 %v1791_v20 }
0x1736   :  { %v1512_v11 = vpop.f32.mrb[30].mxu0 }
0x1737   :  { %1573 = vrot.lane.b32.xlu1 %v1571_v10, %s2140_s16  ;;  %v1995_v14 = vpop.f32.mrb[31].mxu0  ;;  %v1790_v54 = vmul.f32 -1.442695, %v1564_v21 }
0x1739   :  { %2118 = vpow2.f32 %v1790_v54 }
0x173f   :  { %v2117_v22 = vpop.eup %2116 }
0x1740   :  { %v1599_v23 = vadd.f32 1.0, %v2117_v22 }
0x1742   :  { %2120 = vrcp.f32 %v1599_v23 }
0x1743   :  { %v2119_v12 = vpop.eup %2118 }
0x1744   :  { %v1568_v25 = vadd.f32 1.0, %v2119_v12 }
0x1746   :  { %2122 = vrcp.f32 %v1568_v25 }
0x174c   :  { %v2121_v59 = vpop.eup %2120 }
0x1750   :  { %v2123_v29 = vpop.eup %2122 }
0x17a5   :  { %v1605_v26 = vpop.permute.xlu0 %1604 }
0x17a6   :  { %v1607_v28 = vmul.f32 %v2121_v59, %v1605_v26 }
0x17a8   :  { %1609 = vrot.lane.b32.xlu0 %v1607_v28, %s2140_s16 }
0x17a9   :  { %v1574_v30 = vpop.permute.xlu1 %1573 }
0x17aa   :  { %v1576_v31 = vmul.f32 %v2123_v29, %v1574_v30 }
0x17ac   :  { %1578 = vrot.lane.b32.xlu1 %v1576_v31, %s2140_s16 }
0x181a   :  { %v1610_v32 = vpop.permute.xlu0 %1609 }
0x181b   :  { %v1612_v33 = vadd.f32 %v1610_v32, %v1594_v8 }
0x181d   :  { %2124 = vtanh.f32 %v1612_v33 }
0x181e   :  { %v1579_v34 = vpop.permute.xlu1 %1578 }
0x181f   :  { %v1581_v36 = vadd.f32 %v1579_v34, %v1563_v19  ;;  %v1647_v19 = vld [vmem:[%s2613_s5] sm:$0x1] }
0x1821   :  { %2126 = vtanh.f32 %v1581_v36 }
0x1827   :  { %v2125_v37 = vpop.eup %2124 }
0x1828   :  { %v1614_v39 = vsub.f32 %v2518_v52, %v2125_v37 }
0x182a   :  { %1616 = vrot.lane.b32.xlu0 %v1614_v39, %s2141_s2 }
0x182b   :  { %v2127_v40 = vpop.eup %2126 }
0x182c   :  { %v1583_v41 = vsub.f32 %v2522_v57, %v2127_v40 }
0x182e   :  { %1585 = vrot.lane.b32.xlu1 %v1583_v41, %s2141_s2 }
0x189c   :  { %v1617_v42 = vpop.permute.xlu0 %1616 }
0x189d   :  { %v1619_v43 = vmul.f32 %v2121_v59, %v1617_v42 }
0x189f   :  { %1621 = vrot.lane.b32.xlu0 %v1619_v43, %s2142_s27 }
0x18a0   :  { %v1586_v44 = vpop.permute.xlu1 %1585 }
0x18a1   :  { %v1588_v45 = vmul.f32 %v2123_v29, %v1586_v44 }
0x18a3   :  { %443 = vrot.lane.b32.xlu0 %v2303_v38, %s2140_s16  ;;  %1590 = vrot.lane.b32.xlu1 %v1588_v45, %s2142_s27 }
0x18a7   :  { %1464 = vrot.lane.b32.xlu0 %v2518_v52, %s2141_s2  ;;  %613 = vrot.lane.b32.xlu1 %v2339_v27, %s2140_s16 }
0x18ab   :  { %783 = vrot.lane.b32.xlu0 %v2375_v16, %s2140_s16 }
0x18af   :  { %1128 = vrot.lane.b32.xlu0 %v2443_v62, %s2141_s2 }
0x18b3   :  { %789 = vrot.lane.b32.xlu0 %v2371_v13, %s2141_s2 }
0x18b7   :  { %1123 = vrot.lane.b32.xlu0 %v2447_v1, %s2140_s16 }
0x18bb   :  { %448 = vrot.lane.b32.xlu0 %v2299_v35, %s2141_s2 }
0x18bf   :  { %1459 = vrot.lane.b32.xlu0 %v2522_v57, %s2140_s16 }
0x1911   :  { %v1622_v38 = vpop.permute.xlu0 %1621 }
0x1912   :  { %v1624_v27 = vadd.f32 %v2125_v37, %v1622_v38 }
0x1914   :  { %1631 = vrot.lane.b32.xlu1 %v1624_v27, %s2141_s2 }
0x1915   :  { %v444_v16 = vpop.permute.xlu0 %443  ;;  %v1591_v46 = vpop.permute.xlu1 %1590 }
0x1916   :  { %446 = vst.msk [vmem:[#allocation4] sm:$0xff] %vm267_vm5, %v444_v16  ;;  %v1593_v48 = vadd.f32 %v2127_v40, %v1591_v46 }
0x1918   :  { %953 = vrot.lane.b32.xlu1 %v2411_v6, %s2140_s16 }
0x1919   :  { %v1465_v13 = vpop.permute.xlu0 %1464  ;;  %v614_v62 = vpop.permute.xlu1 %613 }
0x191a   :  { %617 = vst.msk [vmem:[#allocation4 + $0x8] sm:$0xff] %vm267_vm5, %v614_v62 }
0x191b   :  { %1467 = vst.msk [vmem:[#allocation4 + $0x8] sm:$0xff] %vm452_vm6, %v1465_v13 }
0x191c   :  { %1296 = vrot.lane.b32.xlu1 %v2479_v56, %s2141_s2 }
0x191d   :  { %v784_v35 = vpop.permute.xlu0 %783 }
0x191e   :  { %787 = vst.msk [vmem:[#allocation4 + $0x10] sm:$0xff] %vm267_vm5, %v784_v35 }
0x1920   :  { %959 = vrot.lane.b32.xlu1 %v2407_v3, %s2141_s2  ;;  %v1648_v3 = vld [vmem:[%s2612_s6] sm:$0x3] }
0x1921   :  { %v1129_v1 = vpop.permute.xlu0 %1128  ;;  %1651 = vperm.xlu0 %2023, %v1648_v3  }
0x1922   :  { %v1636_v51 = vld [vmem:[#allocation4 + $0x8] sm:$0xff] }
0x1924   :  { %1291 = vrot.lane.b32.xlu1 %v2483_v60, %s2140_s16 }
0x1925   :  { %v790_v6 = vpop.permute.xlu0 %789 }
0x1926   :  { %793 = vst.msk [vmem:[#allocation4 + $0x28] sm:$0xff] %vm452_vm6, %v790_v6 }
0x1928   :  { %619 = vrot.lane.b32.xlu1 %v2335_v24, %s2141_s2 }
0x1929   :  { %v1124_v47 = vpop.permute.xlu0 %1123 }
0x192c   :  { %1626 = vrot.lane.b32.xlu1 %v1593_v48, %s2140_s16 }
0x192d   :  { %v449_v56 = vpop.permute.xlu0 %448 }
0x192e   :  { %453 = vst.msk [vmem:[#allocation4 + $0x38] sm:$0xff] %vm452_vm6, %v449_v56 }
0x1931   :  { %v1460_v17 = vpop.permute.xlu0 %1459 }
0x1986   :  { %v1632_v49 = vpop.permute.xlu1 %1631 }
0x1987   :  { %1634 = vst.msk [vmem:[#allocation4] sm:$0xff] %vm452_vm6, %v1632_v49 }
0x198a   :  { %v954_v60 = vpop.permute.xlu1 %953 }
0x198b   :  { %957 = vst.msk [vmem:[#allocation4 + $0x18] sm:$0xff] %vm267_vm5, %v954_v60 }
0x198c   :  { %1131 = vst.msk [vmem:[#allocation4 + $0x18] sm:$0xff] %vm452_vm6, %v1129_v1 }
0x198e   :  { %v1297_v24 = vpop.permute.xlu1 %1296  ;;  %v1635_v50 = vld [vmem:[#allocation4] sm:$0xff] }
0x198f   :  { %1299 = vst.msk [vmem:[#allocation4 + $0x10] sm:$0xff] %vm452_vm6, %v1297_v24  ;;  %v1643_v52 = vpack.c.bf16 %v1636_v51, %v1635_v50 }
0x1991   :  { %v1659_v53 = vsel %vm1654_vm7, %v1643_v52, 0 }
0x1992   :  { %2005 = vmatpush3.bf16.xpose.msra.mxu0 %v1659_v53  ;;  %v960_v55 = vpop.permute.xlu1 %959 }
0x1993   :  { %963 = vst.msk [vmem:[#allocation4 + $0x20] sm:$0xff] %vm452_vm6, %v960_v55  ;;  %2006 = vmatprep.subr.bf16.mxu0 %v2137_v9  ;;  %v1638_v61 = vld [vmem:[#allocation4 + $0x18] sm:$0xff] }
0x1994   :  { %1126 = vst.msk [vmem:[#allocation4 + $0x20] sm:$0xff] %vm267_vm5, %v1124_v47 }
0x1996   :  { %v1292_v57 = vpop.permute.xlu1 %1291  ;;  %v1637_v58 = vld [vmem:[#allocation4 + $0x10] sm:$0xff] }
0x1997   :  { %1294 = vst.msk [vmem:[#allocation4 + $0x28] sm:$0xff] %vm267_vm5, %v1292_v57  ;;  %v1644_v63 = vpack.c.bf16 %v1638_v61, %v1637_v58 }
0x1999   :  { %v1662_v0 = vsel %vm1654_vm7, %v1644_v63, 0 }
0x199a   :  { %2007 = vmatpush3.bf16.xpose.msra.mxu0 %v1662_v0  ;;  %v620_v2 = vpop.permute.xlu1 %619 }
0x199b   :  { %623 = vst.msk [vmem:[#allocation4 + $0x30] sm:$0xff] %vm452_vm6, %v620_v2  ;;  %2008 = vmatprep.subr.bf16.mxu0 %v2137_v9  ;;  %v1639_v5 = vld [vmem:[#allocation4 + $0x20] sm:$0xff] }
0x199c   :  { %1462 = vst.msk [vmem:[#allocation4 + $0x30] sm:$0xff] %vm267_vm5, %v1460_v17 }
0x199e   :  { %v1627_v4 = vpop.permute.xlu1 %1626  ;;  %v1640_v7 = vld [vmem:[#allocation4 + $0x28] sm:$0xff] }
0x199f   :  { %1629 = vst.msk [vmem:[#allocation4 + $0x38] sm:$0xff] %vm267_vm5, %v1627_v4  ;;  %v1645_v10 = vpack.c.bf16 %v1640_v7, %v1639_v5 }
0x19a0   :  { %v1652_v20 = vpop.permute.xlu0 %1651 }
0x19a1   :  { %v1665_v18 = vsel %vm1654_vm7, %v1645_v10, 0 }
0x19a2   :  { %2009 = vmatpush3.bf16.xpose.msra.mxu0 %v1665_v18 }
0x19a3   :  { %2010 = vmatprep.subr.bf16.mxu0 %v2137_v9  ;;  %v1641_v11 = vld [vmem:[#allocation4 + $0x30] sm:$0xff] }
0x19a6   :  { %v1642_v14 = vld [vmem:[#allocation4 + $0x38] sm:$0xff] }
0x19a7   :  { %v1646_v8 = vpack.c.bf16 %v1642_v14, %v1641_v11 }
0x19a9   :  { %v1668_v15 = vsel %vm1654_vm7, %v1646_v8, 0 }
0x19aa   :  { %2011 = vmatpush3.bf16.xpose.msra.mxu0 %v1668_v15 }
0x19b1   :  { %2013 = vmatmul.mubr.msk.bf16.vlgmr.msra.gmra.mrb[32].mxu0 %vm1654_vm7, %v1647_v19 }
0x1a84   :  { %v1704_v21 = vpop.f32.mrb[32].mxu0 }
0x1a85   :  { %v1705_v54 = vadd.f32 %v1704_v21, %v1652_v20  ;;  %v2014_v22 = vpop.f32.mrb[33].mxu0 }
0x1a86   :  { %v1707_v23 = vpop.f32.mrb[34].mxu0 }
0x1a87   :  { %v1713_v12 = vand.u32 2147483647, %v1705_v54  ;;  %v2015_v25 = vpop.f32.mrb[35].mxu0  ;;  %v1710_v29 = vmul.f32 1.442695, %v1705_v54  ;;  %v1712_v37 = vmax.f32 %v1705_v54, 0.0 }
0x1a89   :  { %v1714_v9 = vsub.f32 0.0, %v1713_v12 }
0x1a8b   :  { %v1715_v59 = vmul.f32 1.442695, %v1714_v9 }
0x1a8d   :  { %2128 = vpow2.f32 %v1715_v59 }
0x1a97   :  { %v2129_v26 = vpop.eup %2128 }
0x1a98   :  { %v1717_v28 = vadd.f32 1.0, %v2129_v26  ;;  %v1720_v30 = vmul.f32 -0.5, %v2129_v26  ;;  %v1723_v32 = vand.u32 2147483647, %v2129_v26 }
0x1a9a   :  { %2130 = vlog2.f32 %v1717_v28  ;;  %v1721_v31 = vadd.f32 1.0, %v1720_v30  ;;  %vm1724_vm8 = vcmp.lt.f32.partialorder %v1723_v32, 0.0004427343 }
0x1a9b   :  { %2132 = vpow2.f32 %v1710_v29 }
0x1a9c   :  { %v1722_v36 = vmul.f32 %v2129_v26, %v1721_v31 }
0x1aa4   :  { %v2131_v33 = vpop.eup %2130 }
0x1aa5   :  { %v1719_v34 = vmul.f32 0.6931472, %v2131_v33  ;;  %v2133_v41 = vpop.eup %2132 }
0x1aa7   :  { %v1725_v39 = vsel %vm1724_vm8, %v1722_v36, %v1719_v34 }
0x1aa8   :  { %v1726_v40 = vadd.f32 %v1725_v39, %v1712_v37 }
0x1aaa   :  { %v1728_v42 = vsel %vm1727_vm9, %v2133_v41, %v1726_v40 }
0x1aab   :  { %1730 = vst.msk [vmem:[%s2614_s7] sm:$0x3] %vm1729_vm10, %v1728_v42 }

</bundles_post_ra>
